<compile_context>
chip_gen: v5e
topology: v5e:2x2
jax: 0.10.0
libtpu: 0.0.40
codegen_flags: <defaults>
</compile_context>

<pallas_src>
import numpy as np
import jax
import jax.numpy as jnp
from jax.experimental import pallas as pl
from jax.experimental.pallas import tpu as pltpu

POS = 5
N_FEATURE = 16
ENC_HID = N_FEATURE // 2        # 8   (Encoder LSTMCell hidden)
DEC_HID = N_FEATURE             # 16  (Decoder LSTMCell hidden)
STATE_W = POS + N_FEATURE       # 21  packed node-state lanes: [box(5) | feature(16)]


def _lstm_iofg(gates, c, hid):
    """LSTMCell update with gate columns pre-permuted to [i, f, o, g]."""
    sg = jax.nn.sigmoid(gates[:, 0:3 * hid])        # one contiguous sigmoid
    i = sg[:, 0:hid]
    f = sg[:, hid:2 * hid]
    o = sg[:, 2 * hid:3 * hid]
    g = jnp.tanh(gates[:, 3 * hid:4 * hid])
    c_o = f * c + i * g
    h_o = o * jnp.tanh(c_o)
    return h_o, c_o


def _make_ae_kernel(level_sizes, n_nodes, layout, dec_weights):
    """Fully fused encode+decode kernel (single invocation, no grid)."""
    num_levels = len(level_sizes)

    def kernel(state_ref, const_ref, checks_ref, lossp_ref):
        f32 = jnp.float32

        def sect(name, h, w):
            r0 = layout[name]
            return const_ref[r0:r0 + h, 0:w]

        w_enc = sect('w_enc', POS + ENC_HID, 4 * ENC_HID)            # (13, 32)
        b_enc = sect('b_enc', 1, 4 * ENC_HID)                        # (1, 32)
        w_h = sect('w_h', N_FEATURE, 2 * DEC_HID)                    # (16, 32)
        b_h = sect('b_h', 1, 2 * DEC_HID)
        w_dec = sect('w_dec', POS + N_FEATURE + DEC_HID, 4 * DEC_HID)  # (37, 64)
        b_dec = sect('b_dec', 1, 4 * DEC_HID)
        w_lr = sect('w_lr', DEC_HID, 12)                             # (16, 12)
        b_lr = sect('b_lr', 1, 12)

        # Hoisted activation column masks for the fused fc_l|fc_r output.
        # Columns are [xy, xy, wh, wh, a, leaf] for left then the same for right.
        col = jax.lax.broadcasted_iota(jnp.int32, (1, 12), 1)
        tanh_m = (col == 0) | (col == 1) | (col == 6) | (col == 7)
        id_m = (col == 4) | (col == 10)

        # Node state stays in registers for the whole encode + decode.
        state = state_ref[...]                                       # (n_nodes, 21)

        # ------------------------- encode: bottom-up ------------------------- #
        for lvl in range(num_levels):
            ni = level_sizes[lvl]
            g0 = layout['g%d' % lvl]
            s0 = layout['s%d' % lvl]
            G = const_ref[g0:g0 + 3 * ni, 0:n_nodes]         # rows [left;right;father]
            S = const_ref[s0:s0 + n_nodes, 0:3 * ni + 2]
            S_f = S[:, 2 * ni + 1:3 * ni + 1]                # father scatter one-hots
            sel_f = S[:, 3 * ni + 1:3 * ni + 2]              # father row-select mask

            gathered = jnp.dot(G, state, preferred_element_type=f32)   # (3ni, 21)
            ph = gathered[0:2 * ni, 0:POS + ENC_HID]         # [box | h]   (2ni, 13)
            c_in = gathered[0:2 * ni, POS + ENC_HID:STATE_W]  # c          (2ni, 8)
            gates = jnp.dot(ph, w_enc, preferred_element_type=f32) + b_enc
            h_o, c_o = _lstm_iofg(gates, c_in, ENC_HID)      # (2ni, 8) each
            h_sum = h_o[0:ni] + h_o[ni:2 * ni]               # register-resident combine
            c_sum = c_o[0:ni] + c_o[ni:2 * ni]
            # father rows keep their box, get the new feature [h_sum | c_sum]
            new_fa = jnp.concatenate(
                [gathered[2 * ni:3 * ni, 0:POS], h_sum, c_sum], axis=1)   # (ni, 21)
            state = state * (1.0 - sel_f) + jnp.dot(
                S_f, new_fa, preferred_element_type=f32)

        # -------------------------- decode: top-down ------------------------- #
        loss_acc = jnp.float32(0.0)
        check_rows = []
        for it in range(num_levels):
            lvl = num_levels - 1 - it
            ni = level_sizes[lvl]
            g0 = layout['g%d' % lvl]
            s0 = layout['s%d' % lvl]
            G = const_ref[g0:g0 + 3 * ni, 0:n_nodes]
            S = const_ref[s0:s0 + n_nodes, 0:3 * ni + 2]
            S_lr = S[:, 0:2 * ni]                            # child scatter one-hots
            sel_lr = S[:, 2 * ni:2 * ni + 1]                 # child row-select mask

            gathered = jnp.dot(G, state, preferred_element_type=f32)   # (3ni, 21)
            fa = gathered[2 * ni:3 * ni, :]                  # father [abs box | feat]
            child_gt = gathered[0:2 * ni, 0:POS]             # GT relative child boxes
            f_father = fa[:, POS:STATE_W]

            # z = relu(fc_h(F)); chunk -> (h_father, c_father)
            z = jnp.maximum(
                jnp.dot(f_father, w_h, preferred_element_type=f32) + b_h, 0.0)
            h_f = z[:, 0:DEC_HID]
            c_f = z[:, DEC_HID:2 * DEC_HID]

            # LSTMCell on cat(P_father, F_father) with state (h_father, c_father);
            # single fused dot on [P | F | h_father] against a stacked weight.
            cat_in = jnp.concatenate([fa, h_f], axis=1)      # (ni, 37)
            gates = jnp.dot(cat_in, w_dec, preferred_element_type=f32) + b_dec
            h_o, c_o = _lstm_iofg(gates, c_f, DEC_HID)       # (ni, 16)

            # fused fc_l | fc_r (block-diagonal weight), then activations
            y = jnp.dot(h_o, w_lr, preferred_element_type=f32) + b_lr    # (ni, 12)
            act = jnp.where(tanh_m, jnp.tanh(y),
                            jnp.where(id_m, y, jax.nn.sigmoid(y)))
            rec = jnp.concatenate([act[:, 0:POS], act[:, 6:6 + POS]], axis=0)
            # TODO(synk): act[:, 5:6] / act[:, 11:12] are is-leaf probabilities; the
            # BCE leaf-loss path (leaf_loss=True) is not implemented.

            # F.l1_loss(P_rec, P_gt, reduction='mean') per level (ni*5 elements)
            inv = 1.0 / float(ni * POS)
            diff = jnp.abs(rec - child_gt)
            l_re = jnp.sum(diff[0:ni]) * inv
            r_re = jnp.sum(diff[ni:2 * ni]) * inv
            check_rows.append(jnp.concatenate(
                [jnp.reshape(l_re, (1, 1)), jnp.reshape(r_re, (1, 1))], axis=1))
            loss_acc = loss_acc + (l_re + r_re) * dec_weights[it]

            # new child features: left = [h_l | c_l], right = [h_r | c_r]
            half = DEC_HID // 2
            child_feat = jnp.concatenate(
                [jnp.concatenate([h_o[:, 0:half], c_o[:, 0:half]], axis=1),
                 jnp.concatenate([h_o[:, half:DEC_HID], c_o[:, half:DEC_HID]],
                                 axis=1)], axis=0)           # (2ni, 16)

            # absolute-box composition of GT relative children with father absolute
            # (matches the reference: X_ab_xy children are composed from the GT
            #  relative box, not the reconstructed one).
            fa2 = jnp.concatenate([fa[:, 0:POS], fa[:, 0:POS]], axis=0)  # (2ni, 5)
            child_box = jnp.concatenate(
                [child_gt[:, 0:2] * fa2[:, 2:4] + fa2[:, 0:2],
                 child_gt[:, 2:4] * fa2[:, 2:4],
                 child_gt[:, 4:5] + fa2[:, 4:5]], axis=1)    # (2ni, 5)

            new_rows = jnp.concatenate([child_box, child_feat], axis=1)  # (2ni, 21)
            state = state * (1.0 - sel_lr) + jnp.dot(
                S_lr, new_rows, preferred_element_type=f32)

        checks_ref[...] = jnp.concatenate(check_rows, axis=0)   # (num_levels, 2)
        lossp_ref[...] = jnp.reshape(loss_acc * (1.0 / num_levels), (1, 1))

    return kernel


def _reorder_ifog(w, hid):
    """Permute torch LSTM gate blocks [i, f, g, o] -> [i, f, o, g] along axis 0."""
    return jnp.concatenate(
        [w[0:2 * hid], w[3 * hid:4 * hid], w[2 * hid:3 * hid]], axis=0)


# --------------------------------- AE forward -------------------------------- #
def ae_forward(X, Feature, I_list, Node_is_leaf, params,
               weight_type=0, leaf_loss=False, weight_leaf=1.0):
    # Node_is_leaf only feeds the (disabled) BCE leaf-loss path.
    # TODO(synk): leaf BCE loss path (leaf_loss=True) is not implemented.
    del Node_is_leaf, leaf_loss, weight_leaf
    X = X[0].astype(jnp.float32)                 # squeeze(0) -> (n, 5)
    Feature = Feature[0].astype(jnp.float32)     # (n, 16)
    n_nodes = int(X.shape[0])
    num_I = len(I_list)

    # Tree topology is compile-time static: merge indices are baked into
    # host-built one-hot gather/scatter matrices (one pair per level).
    I_np = [np.asarray(I_b).reshape(-1, 3).astype(np.int64) for I_b in I_list]
    level_sizes = tuple(int(I.shape[0]) for I in I_np)

    dec_weights = []
    for i in range(num_I):                       # i == decode iteration (top-down)
        w = 1.0
        if weight_type == 1:
            w = float(2 ** (num_I - i - 1))
        elif weight_type == 2:
            w = float(2 * (num_I - i))
        elif weight_type == 3:
            w = float(2 ** (num_I - i - 1)) / 2.0
        dec_weights.append(w)

    # ---- fuse / pre-transpose the tiny weights (gate order -> [i,f,o,g]) ----
    p = params
    w_enc = _reorder_ifog(
        jnp.concatenate([p['enc_wih'], p['enc_whh']], axis=1), ENC_HID).T   # (13,32)
    b_enc = _reorder_ifog((p['enc_bih'] + p['enc_bhh'])[:, None], ENC_HID).T
    w_h = p['dec_fch_w'].T                                                  # (16,32)
    b_h = p['dec_fch_b'][None, :]
    w_dec = _reorder_ifog(
        jnp.concatenate([p['dec_wih'], p['dec_whh']], axis=1), DEC_HID).T   # (37,64)
    b_dec = _reorder_ifog((p['dec_bih'] + p['dec_bhh'])[:, None], DEC_HID).T
    w_lr = jnp.zeros((DEC_HID, 12), jnp.float32)                            # (16,12)
    w_lr = w_lr.at[0:ENC_HID, 0:6].set(p['fcl_w'].T)
    w_lr = w_lr.at[ENC_HID:DEC_HID, 6:12].set(p['fcr_w'].T)
    b_lr = jnp.concatenate([p['fcl_b'], p['fcr_b']])[None, :]

    # ---- per-level one-hot gather/scatter matrices (host-built, static) ----
    entries = [('w_enc', w_enc), ('b_enc', b_enc), ('w_h', w_h), ('b_h', b_h),
               ('w_dec', w_dec), ('b_dec', b_dec), ('w_lr', w_lr), ('b_lr', b_lr)]
    for lvl, I in enumerate(I_np):
        ni = int(I.shape[0])
        left, right, father = I[:, 0], I[:, 1], I[:, 2]
        G = np.zeros((3 * ni, n_nodes), np.float32)          # rows [left;right;father]
        G[np.arange(ni), left] = 1.0
        G[ni + np.arange(ni), right] = 1.0
        G[2 * ni + np.arange(ni), father] = 1.0
        S = np.zeros((n_nodes, 3 * ni + 2), np.float32)
        S[left, np.arange(ni)] = 1.0                         # child scatter
        S[right, ni + np.arange(ni)] = 1.0
        S[:, 2 * ni] = S[:, 0:2 * ni].sum(axis=1)            # child row-select mask
        S[father, 2 * ni + 1 + np.arange(ni)] = 1.0          # father scatter
        S[:, 3 * ni + 1] = S[:, 2 * ni + 1:3 * ni + 1].sum(axis=1)  # father mask
        entries.append(('g%d' % lvl, G))
        entries.append(('s%d' % lvl, S))

    # ---- pack everything into ONE lane-dense f32 slab (one DMA) ----
    layout = {}
    rows = 0
    slab_w = 0
    for name, val in entries:
        layout[name] = rows
        rows += ((int(val.shape[0]) + 7) // 8) * 8
        slab_w = max(slab_w, int(val.shape[1]))
    slab = jnp.zeros((rows, slab_w), jnp.float32)
    for name, val in entries:
        r0 = layout[name]
        h, w = int(val.shape[0]), int(val.shape[1])
        slab = slab.at[r0:r0 + h, 0:w].set(jnp.asarray(val, jnp.float32))

    # packed node state: lanes [0:5] = X_ab_xy box, lanes [5:21] = feature
    state0 = jnp.concatenate([X, Feature], axis=1)           # (n_nodes, 21)

    kernel = _make_ae_kernel(level_sizes, n_nodes, layout, tuple(dec_weights))

    def vmem():
        return pl.BlockSpec(memory_space=pltpu.MemorySpace.VMEM)

    checks, loss_p = pl.pallas_call(
        kernel,
        out_shape=(jax.ShapeDtypeStruct((num_I, 2), jnp.float32),   # per-level l/r L1
                   jax.ShapeDtypeStruct((1, 1), jnp.float32)),      # Loss_P
        in_specs=[vmem(), vmem()],
        out_specs=(vmem(), vmem()),
        compiler_params=pltpu.CompilerParams(
            vmem_limit_bytes=32 * 1024 * 1024),
    )(state0, slab)

    Loss_P = loss_p[0, 0]
    Loss_ab = jnp.float32(0.0)
    Loss_Leaf = jnp.float32(0.0)
    Loss = Loss_ab + Loss_P + Loss_Leaf
    left_check = [checks[i, 0] for i in range(num_I)]
    right_check = [checks[i, 1] for i in range(num_I)]
    return Loss, Loss_ab, Loss_P, Loss_Leaf, left_check, right_check


# --------------------------------- param init -------------------------------- #
def init_params(key):
    """Raw torch-layout parameters (Encoder/Decoder LSTMCells + Linears)."""
    def unif(k, shape, bound):
        return jax.random.uniform(k, shape, jnp.float32, -bound, bound)

    ks = jax.random.split(key, 14)
    b_e = 1.0 / float(np.sqrt(ENC_HID))
    b_h = 1.0 / float(np.sqrt(N_FEATURE))
    b_d = 1.0 / float(np.sqrt(DEC_HID))
    b_lr = 1.0 / float(np.sqrt(N_FEATURE // 2))
    return {
        'enc_wih': unif(ks[0], (4 * ENC_HID, POS), b_e),
        'enc_whh': unif(ks[1], (4 * ENC_HID, ENC_HID), b_e),
        'enc_bih': unif(ks[2], (4 * ENC_HID,), b_e),
        'enc_bhh': unif(ks[3], (4 * ENC_HID,), b_e),
        'dec_fch_w': unif(ks[4], (2 * N_FEATURE, N_FEATURE), b_h),
        'dec_fch_b': unif(ks[5], (2 * N_FEATURE,), b_h),
        'dec_wih': unif(ks[6], (4 * DEC_HID, N_FEATURE + POS), b_d),
        'dec_whh': unif(ks[7], (4 * DEC_HID, DEC_HID), b_d),
        'dec_bih': unif(ks[8], (4 * DEC_HID,), b_d),
        'dec_bhh': unif(ks[9], (4 * DEC_HID,), b_d),
        'fcl_w': unif(ks[10], (6, N_FEATURE // 2), b_lr),
        'fcl_b': unif(ks[11], (6,), b_lr),
        'fcr_w': unif(ks[12], (6, N_FEATURE // 2), b_lr),
        'fcr_b': unif(ks[13], (6,), b_lr),
    }


if __name__ == "__main__":
    key = jax.random.PRNGKey(0)
    kx, kf, kp = jax.random.split(key, 3)

    # Complete binary tree: 8 leaves (0..7), internal nodes 8..14, root 14.
    n_nodes = 15
    X = jax.random.uniform(kx, (1, n_nodes, 5), jnp.float32, 0.1, 0.9)
    Feature = jax.random.normal(kf, (1, n_nodes, N_FEATURE), jnp.float32) * 0.1
    Node_is_leaf = jnp.concatenate(
        [jnp.ones((1, 8, 1), jnp.float32), jnp.zeros((1, 7, 1), jnp.float32)], axis=1)
    I_list = [
        jnp.array([[[0, 1, 8], [2, 3, 9], [4, 5, 10], [6, 7, 11]]], dtype=jnp.int32),
        jnp.array([[[8, 9, 12], [10, 11, 13]]], dtype=jnp.int32),
        jnp.array([[[12, 13, 14]]], dtype=jnp.int32),
    ]

    params = init_params(kp)

    @jax.jit
    def fwd(X_, F_, nl):
        # I_list / params are closed over: tree topology is compile-time static.
        return ae_forward(X_, F_, I_list, nl, params)

    outs = fwd(X, Feature, Node_is_leaf)
    jax.block_until_ready(outs)
    print("KERNEL_OK")
</pallas_src>

<mosaic_0001>
module attributes {stable_mosaic.version = 11 : i64} {
  func.func @kernel(%arg0: memref<15x21xf32, #tpu.memory_space<vmem>>, %arg1: memref<200x64xf32, #tpu.memory_space<vmem>>, %arg2: memref<3x2xf32, #tpu.memory_space<vmem>>, %arg3: memref<1x1xf32, #tpu.memory_space<vmem>>) attributes {dimension_semantics = [], scalar_prefetch = 0 : i64, scratch_operands = 0 : i64, tpu.core_type = #tpu.core_type<tc>} {
    %c0 = arith.constant 0 : index
    %c0_0 = arith.constant 0 : index
    %0 = vector.load %arg1[%c0, %c0_0] : memref<200x64xf32, #tpu.memory_space<vmem>>, vector<13x32xf32>
    %c16 = arith.constant 16 : index
    %c0_1 = arith.constant 0 : index
    %1 = vector.load %arg1[%c16, %c0_1] : memref<200x64xf32, #tpu.memory_space<vmem>>, vector<1x32xf32>
    %c24 = arith.constant 24 : index
    %c0_2 = arith.constant 0 : index
    %2 = vector.load %arg1[%c24, %c0_2] : memref<200x64xf32, #tpu.memory_space<vmem>>, vector<16x32xf32>
    %c40 = arith.constant 40 : index
    %c0_3 = arith.constant 0 : index
    %3 = vector.load %arg1[%c40, %c0_3] : memref<200x64xf32, #tpu.memory_space<vmem>>, vector<1x32xf32>
    %c48 = arith.constant 48 : index
    %c0_4 = arith.constant 0 : index
    %4 = vector.load %arg1[%c48, %c0_4] : memref<200x64xf32, #tpu.memory_space<vmem>>, vector<37x64xf32>
    %c88 = arith.constant 88 : index
    %c0_5 = arith.constant 0 : index
    %5 = vector.load %arg1[%c88, %c0_5] : memref<200x64xf32, #tpu.memory_space<vmem>>, vector<1x64xf32>
    %c96 = arith.constant 96 : index
    %c0_6 = arith.constant 0 : index
    %6 = vector.load %arg1[%c96, %c0_6] : memref<200x64xf32, #tpu.memory_space<vmem>>, vector<16x12xf32>
    %c112 = arith.constant 112 : index
    %c0_7 = arith.constant 0 : index
    %7 = vector.load %arg1[%c112, %c0_7] : memref<200x64xf32, #tpu.memory_space<vmem>>, vector<1x12xf32>
    %8 = tpu.iota {dimensions = array<i32: 1>} : vector<1x12xi32>
    %c0_i32 = arith.constant 0 : i32
    %9 = vector.broadcast %c0_i32 : i32 to vector<1x12xi32>
    %10 = arith.cmpi eq, %8, %9 : vector<1x12xi32>
    %c1_i32 = arith.constant 1 : i32
    %11 = vector.broadcast %c1_i32 : i32 to vector<1x12xi32>
    %12 = arith.cmpi eq, %8, %11 : vector<1x12xi32>
    %13 = arith.ori %10, %12 : vector<1x12xi1>
    %c6_i32 = arith.constant 6 : i32
    %14 = vector.broadcast %c6_i32 : i32 to vector<1x12xi32>
    %15 = arith.cmpi eq, %8, %14 : vector<1x12xi32>
    %16 = arith.ori %13, %15 : vector<1x12xi1>
    %c7_i32 = arith.constant 7 : i32
    %17 = vector.broadcast %c7_i32 : i32 to vector<1x12xi32>
    %18 = arith.cmpi eq, %8, %17 : vector<1x12xi32>
    %19 = arith.ori %16, %18 : vector<1x12xi1>
    %c4_i32 = arith.constant 4 : i32
    %20 = vector.broadcast %c4_i32 : i32 to vector<1x12xi32>
    %21 = arith.cmpi eq, %8, %20 : vector<1x12xi32>
    %c10_i32 = arith.constant 10 : i32
    %22 = vector.broadcast %c10_i32 : i32 to vector<1x12xi32>
    %23 = arith.cmpi eq, %8, %22 : vector<1x12xi32>
    %24 = arith.ori %21, %23 : vector<1x12xi1>
    %c0_8 = arith.constant 0 : index
    %c0_9 = arith.constant 0 : index
    %25 = vector.load %arg0[%c0_8, %c0_9] : memref<15x21xf32, #tpu.memory_space<vmem>>, vector<15x21xf32>
    %c120 = arith.constant 120 : index
    %c0_10 = arith.constant 0 : index
    %26 = vector.load %arg1[%c120, %c0_10] : memref<200x64xf32, #tpu.memory_space<vmem>>, vector<12x15xf32>
    %c136 = arith.constant 136 : index
    %c0_11 = arith.constant 0 : index
    %27 = vector.load %arg1[%c136, %c0_11] : memref<200x64xf32, #tpu.memory_space<vmem>>, vector<15x14xf32>
    %28 = vector.extract_strided_slice %27 {offsets = [0, 9], sizes = [15, 4], strides = [1, 1]} : vector<15x14xf32> to vector<15x4xf32>
    %29 = vector.extract_strided_slice %27 {offsets = [0, 13], sizes = [15, 1], strides = [1, 1]} : vector<15x14xf32> to vector<15x1xf32>
    %cst = arith.constant dense<0.000000e+00> : vector<12x21xf32>
    %30 = tpu.matmul %26, %25, %cst {dimension_numbers = #tpu.dot_dimension_numbers<[1], [0], [0], [1], [0, 0, 1, 1], [], []>} : vector<12x15xf32>, vector<15x21xf32>, vector<12x21xf32> -> vector<12x21xf32>
    %31 = vector.extract_strided_slice %30 {offsets = [0, 0], sizes = [8, 13], strides = [1, 1]} : vector<12x21xf32> to vector<8x13xf32>
    %32 = vector.extract_strided_slice %30 {offsets = [0, 13], sizes = [8, 8], strides = [1, 1]} : vector<12x21xf32> to vector<8x8xf32>
    %cst_12 = arith.constant dense<0.000000e+00> : vector<8x32xf32>
    %33 = tpu.matmul %31, %0, %cst_12 {dimension_numbers = #tpu.dot_dimension_numbers<[1], [0], [0], [1], [0, 0, 1, 1], [], []>} : vector<8x13xf32>, vector<13x32xf32>, vector<8x32xf32> -> vector<8x32xf32>
    %34 = vector.broadcast %1 : vector<1x32xf32> to vector<8x32xf32>
    %35 = arith.addf %33, %34 : vector<8x32xf32>
    %36 = vector.extract_strided_slice %35 {offsets = [0, 0], sizes = [8, 24], strides = [1, 1]} : vector<8x32xf32> to vector<8x24xf32>
    %37 = arith.negf %36 : vector<8x24xf32>
    %38 = math.exp %37 : vector<8x24xf32>
    %cst_13 = arith.constant 1.000000e+00 : f32
    %39 = vector.broadcast %cst_13 : f32 to vector<8x24xf32>
    %40 = arith.addf %39, %38 : vector<8x24xf32>
    %41 = arith.divf %39, %40 : vector<8x24xf32>
    %42 = vector.extract_strided_slice %41 {offsets = [0, 0], sizes = [8, 8], strides = [1, 1]} : vector<8x24xf32> to vector<8x8xf32>
    %43 = vector.extract_strided_slice %41 {offsets = [0, 8], sizes = [8, 8], strides = [1, 1]} : vector<8x24xf32> to vector<8x8xf32>
    %44 = vector.extract_strided_slice %41 {offsets = [0, 16], sizes = [8, 8], strides = [1, 1]} : vector<8x24xf32> to vector<8x8xf32>
    %45 = vector.extract_strided_slice %35 {offsets = [0, 24], sizes = [8, 8], strides = [1, 1]} : vector<8x32xf32> to vector<8x8xf32>
    %46 = math.tanh %45 : vector<8x8xf32>
    %47 = arith.mulf %43, %32 : vector<8x8xf32>
    %48 = arith.mulf %42, %46 : vector<8x8xf32>
    %49 = arith.addf %47, %48 : vector<8x8xf32>
    %50 = math.tanh %49 : vector<8x8xf32>
    %51 = arith.mulf %44, %50 : vector<8x8xf32>
    %52 = vector.extract_strided_slice %51 {offsets = [0, 0], sizes = [4, 8], strides = [1, 1]} : vector<8x8xf32> to vector<4x8xf32>
    %53 = vector.extract_strided_slice %51 {offsets = [4, 0], sizes = [4, 8], strides = [1, 1]} : vector<8x8xf32> to vector<4x8xf32>
    %54 = arith.addf %52, %53 : vector<4x8xf32>
    %55 = vector.extract_strided_slice %49 {offsets = [0, 0], sizes = [4, 8], strides = [1, 1]} : vector<8x8xf32> to vector<4x8xf32>
    %56 = vector.extract_strided_slice %49 {offsets = [4, 0], sizes = [4, 8], strides = [1, 1]} : vector<8x8xf32> to vector<4x8xf32>
    %57 = arith.addf %55, %56 : vector<4x8xf32>
    %58 = vector.extract_strided_slice %30 {offsets = [8, 0], sizes = [4, 5], strides = [1, 1]} : vector<12x21xf32> to vector<4x5xf32>
    %59 = tpu.concatenate %58, %54, %57 in 1 : vector<4x5xf32>, vector<4x8xf32>, vector<4x8xf32> -> vector<4x21xf32>
    %cst_14 = arith.constant 1.000000e+00 : f32
    %60 = vector.broadcast %cst_14 : f32 to vector<15x1xf32>
    %61 = arith.subf %60, %29 : vector<15x1xf32>
    %62 = vector.broadcast %61 : vector<15x1xf32> to vector<15x21xf32>
    %63 = arith.mulf %25, %62 : vector<15x21xf32>
    %cst_15 = arith.constant dense<0.000000e+00> : vector<15x21xf32>
    %64 = tpu.matmul %28, %59, %cst_15 {dimension_numbers = #tpu.dot_dimension_numbers<[1], [0], [0], [1], [0, 0, 1, 1], [], []>} : vector<15x4xf32>, vector<4x21xf32>, vector<15x21xf32> -> vector<15x21xf32>
    %65 = arith.addf %63, %64 : vector<15x21xf32>
    %c152 = arith.constant 152 : index
    %c0_16 = arith.constant 0 : index
    %66 = vector.load %arg1[%c152, %c0_16] : memref<200x64xf32, #tpu.memory_space<vmem>>, vector<6x15xf32>
    %c160 = arith.constant 160 : index
    %c0_17 = arith.constant 0 : index
    %67 = vector.load %arg1[%c160, %c0_17] : memref<200x64xf32, #tpu.memory_space<vmem>>, vector<15x8xf32>
    %68 = vector.extract_strided_slice %67 {offsets = [0, 5], sizes = [15, 2], strides = [1, 1]} : vector<15x8xf32> to vector<15x2xf32>
    %69 = vector.extract_strided_slice %67 {offsets = [0, 7], sizes = [15, 1], strides = [1, 1]} : vector<15x8xf32> to vector<15x1xf32>
    %cst_18 = arith.constant dense<0.000000e+00> : vector<6x21xf32>
    %70 = tpu.matmul %66, %65, %cst_18 {dimension_numbers = #tpu.dot_dimension_numbers<[1], [0], [0], [1], [0, 0, 1, 1], [], []>} : vector<6x15xf32>, vector<15x21xf32>, vector<6x21xf32> -> vector<6x21xf32>
    %71 = vector.extract_strided_slice %70 {offsets = [0, 0], sizes = [4, 13], strides = [1, 1]} : vector<6x21xf32> to vector<4x13xf32>
    %72 = vector.extract_strided_slice %70 {offsets = [0, 13], sizes = [4, 8], strides = [1, 1]} : vector<6x21xf32> to vector<4x8xf32>
    %cst_19 = arith.constant dense<0.000000e+00> : vector<4x32xf32>
    %73 = tpu.matmul %71, %0, %cst_19 {dimension_numbers = #tpu.dot_dimension_numbers<[1], [0], [0], [1], [0, 0, 1, 1], [], []>} : vector<4x13xf32>, vector<13x32xf32>, vector<4x32xf32> -> vector<4x32xf32>
    %74 = vector.broadcast %1 : vector<1x32xf32> to vector<4x32xf32>
    %75 = arith.addf %73, %74 : vector<4x32xf32>
    %76 = vector.extract_strided_slice %75 {offsets = [0, 0], sizes = [4, 24], strides = [1, 1]} : vector<4x32xf32> to vector<4x24xf32>
    %77 = arith.negf %76 : vector<4x24xf32>
    %78 = math.exp %77 : vector<4x24xf32>
    %cst_20 = arith.constant 1.000000e+00 : f32
    %79 = vector.broadcast %cst_20 : f32 to vector<4x24xf32>
    %80 = arith.addf %79, %78 : vector<4x24xf32>
    %81 = arith.divf %79, %80 : vector<4x24xf32>
    %82 = vector.extract_strided_slice %81 {offsets = [0, 0], sizes = [4, 8], strides = [1, 1]} : vector<4x24xf32> to vector<4x8xf32>
    %83 = vector.extract_strided_slice %81 {offsets = [0, 8], sizes = [4, 8], strides = [1, 1]} : vector<4x24xf32> to vector<4x8xf32>
    %84 = vector.extract_strided_slice %81 {offsets = [0, 16], sizes = [4, 8], strides = [1, 1]} : vector<4x24xf32> to vector<4x8xf32>
    %85 = vector.extract_strided_slice %75 {offsets = [0, 24], sizes = [4, 8], strides = [1, 1]} : vector<4x32xf32> to vector<4x8xf32>
    %86 = math.tanh %85 : vector<4x8xf32>
    %87 = arith.mulf %83, %72 : vector<4x8xf32>
    %88 = arith.mulf %82, %86 : vector<4x8xf32>
    %89 = arith.addf %87, %88 : vector<4x8xf32>
    %90 = math.tanh %89 : vector<4x8xf32>
    %91 = arith.mulf %84, %90 : vector<4x8xf32>
    %92 = vector.extract_strided_slice %91 {offsets = [0, 0], sizes = [2, 8], strides = [1, 1]} : vector<4x8xf32> to vector<2x8xf32>
    %93 = vector.extract_strided_slice %91 {offsets = [2, 0], sizes = [2, 8], strides = [1, 1]} : vector<4x8xf32> to vector<2x8xf32>
    %94 = arith.addf %92, %93 : vector<2x8xf32>
    %95 = vector.extract_strided_slice %89 {offsets = [0, 0], sizes = [2, 8], strides = [1, 1]} : vector<4x8xf32> to vector<2x8xf32>
    %96 = vector.extract_strided_slice %89 {offsets = [2, 0], sizes = [2, 8], strides = [1, 1]} : vector<4x8xf32> to vector<2x8xf32>
    %97 = arith.addf %95, %96 : vector<2x8xf32>
    %98 = vector.extract_strided_slice %70 {offsets = [4, 0], sizes = [2, 5], strides = [1, 1]} : vector<6x21xf32> to vector<2x5xf32>
    %99 = tpu.concatenate %98, %94, %97 in 1 : vector<2x5xf32>, vector<2x8xf32>, vector<2x8xf32> -> vector<2x21xf32>
    %cst_21 = arith.constant 1.000000e+00 : f32
    %100 = vector.broadcast %cst_21 : f32 to vector<15x1xf32>
    %101 = arith.subf %100, %69 : vector<15x1xf32>
    %102 = vector.broadcast %101 : vector<15x1xf32> to vector<15x21xf32>
    %103 = arith.mulf %65, %102 : vector<15x21xf32>
    %cst_22 = arith.constant dense<0.000000e+00> : vector<15x21xf32>
    %104 = tpu.matmul %68, %99, %cst_22 {dimension_numbers = #tpu.dot_dimension_numbers<[1], [0], [0], [1], [0, 0, 1, 1], [], []>} : vector<15x2xf32>, vector<2x21xf32>, vector<15x21xf32> -> vector<15x21xf32>
    %105 = arith.addf %103, %104 : vector<15x21xf32>
    %c176 = arith.constant 176 : index
    %c0_23 = arith.constant 0 : index
    %106 = vector.load %arg1[%c176, %c0_23] : memref<200x64xf32, #tpu.memory_space<vmem>>, vector<3x15xf32>
    %c184 = arith.constant 184 : index
    %c0_24 = arith.constant 0 : index
    %107 = vector.load %arg1[%c184, %c0_24] : memref<200x64xf32, #tpu.memory_space<vmem>>, vector<15x5xf32>
    %108 = vector.extract_strided_slice %107 {offsets = [0, 3], sizes = [15, 1], strides = [1, 1]} : vector<15x5xf32> to vector<15x1xf32>
    %109 = vector.extract_strided_slice %107 {offsets = [0, 4], sizes = [15, 1], strides = [1, 1]} : vector<15x5xf32> to vector<15x1xf32>
    %cst_25 = arith.constant dense<0.000000e+00> : vector<3x21xf32>
    %110 = tpu.matmul %106, %105, %cst_25 {dimension_numbers = #tpu.dot_dimension_numbers<[1], [0], [0], [1], [0, 0, 1, 1], [], []>} : vector<3x15xf32>, vector<15x21xf32>, vector<3x21xf32> -> vector<3x21xf32>
    %111 = vector.extract_strided_slice %110 {offsets = [0, 0], sizes = [2, 13], strides = [1, 1]} : vector<3x21xf32> to vector<2x13xf32>
    %112 = vector.extract_strided_slice %110 {offsets = [0, 13], sizes = [2, 8], strides = [1, 1]} : vector<3x21xf32> to vector<2x8xf32>
    %cst_26 = arith.constant dense<0.000000e+00> : vector<2x32xf32>
    %113 = tpu.matmul %111, %0, %cst_26 {dimension_numbers = #tpu.dot_dimension_numbers<[1], [0], [0], [1], [0, 0, 1, 1], [], []>} : vector<2x13xf32>, vector<13x32xf32>, vector<2x32xf32> -> vector<2x32xf32>
    %114 = vector.broadcast %1 : vector<1x32xf32> to vector<2x32xf32>
    %115 = arith.addf %113, %114 : vector<2x32xf32>
    %116 = vector.extract_strided_slice %115 {offsets = [0, 0], sizes = [2, 24], strides = [1, 1]} : vector<2x32xf32> to vector<2x24xf32>
    %117 = arith.negf %116 : vector<2x24xf32>
    %118 = math.exp %117 : vector<2x24xf32>
    %cst_27 = arith.constant 1.000000e+00 : f32
    %119 = vector.broadcast %cst_27 : f32 to vector<2x24xf32>
    %120 = arith.addf %119, %118 : vector<2x24xf32>
    %121 = arith.divf %119, %120 : vector<2x24xf32>
    %122 = vector.extract_strided_slice %121 {offsets = [0, 0], sizes = [2, 8], strides = [1, 1]} : vector<2x24xf32> to vector<2x8xf32>
    %123 = vector.extract_strided_slice %121 {offsets = [0, 8], sizes = [2, 8], strides = [1, 1]} : vector<2x24xf32> to vector<2x8xf32>
    %124 = vector.extract_strided_slice %121 {offsets = [0, 16], sizes = [2, 8], strides = [1, 1]} : vector<2x24xf32> to vector<2x8xf32>
    %125 = vector.extract_strided_slice %115 {offsets = [0, 24], sizes = [2, 8], strides = [1, 1]} : vector<2x32xf32> to vector<2x8xf32>
    %126 = math.tanh %125 : vector<2x8xf32>
    %127 = arith.mulf %123, %112 : vector<2x8xf32>
    %128 = arith.mulf %122, %126 : vector<2x8xf32>
    %129 = arith.addf %127, %128 : vector<2x8xf32>
    %130 = math.tanh %129 : vector<2x8xf32>
    %131 = arith.mulf %124, %130 : vector<2x8xf32>
    %132 = vector.extract_strided_slice %131 {offsets = [0, 0], sizes = [1, 8], strides = [1, 1]} : vector<2x8xf32> to vector<1x8xf32>
    %133 = vector.extract_strided_slice %131 {offsets = [1, 0], sizes = [1, 8], strides = [1, 1]} : vector<2x8xf32> to vector<1x8xf32>
    %134 = arith.addf %132, %133 : vector<1x8xf32>
    %135 = vector.extract_strided_slice %129 {offsets = [0, 0], sizes = [1, 8], strides = [1, 1]} : vector<2x8xf32> to vector<1x8xf32>
    %136 = vector.extract_strided_slice %129 {offsets = [1, 0], sizes = [1, 8], strides = [1, 1]} : vector<2x8xf32> to vector<1x8xf32>
    %137 = arith.addf %135, %136 : vector<1x8xf32>
    %138 = vector.extract_strided_slice %110 {offsets = [2, 0], sizes = [1, 5], strides = [1, 1]} : vector<3x21xf32> to vector<1x5xf32>
    %139 = tpu.concatenate %138, %134, %137 in 1 : vector<1x5xf32>, vector<1x8xf32>, vector<1x8xf32> -> vector<1x21xf32>
    %cst_28 = arith.constant 1.000000e+00 : f32
    %140 = vector.broadcast %cst_28 : f32 to vector<15x1xf32>
    %141 = arith.subf %140, %109 : vector<15x1xf32>
    %142 = vector.broadcast %141 : vector<15x1xf32> to vector<15x21xf32>
    %143 = arith.mulf %105, %142 : vector<15x21xf32>
    %cst_29 = arith.constant dense<0.000000e+00> : vector<15x21xf32>
    %144 = tpu.matmul %108, %139, %cst_29 {dimension_numbers = #tpu.dot_dimension_numbers<[1], [0], [0], [1], [0, 0, 1, 1], [], []>} : vector<15x1xf32>, vector<1x21xf32>, vector<15x21xf32> -> vector<15x21xf32>
    %145 = arith.addf %143, %144 : vector<15x21xf32>
    %c176_30 = arith.constant 176 : index
    %c0_31 = arith.constant 0 : index
    %146 = vector.load %arg1[%c176_30, %c0_31] : memref<200x64xf32, #tpu.memory_space<vmem>>, vector<3x15xf32>
    %c184_32 = arith.constant 184 : index
    %c0_33 = arith.constant 0 : index
    %147 = vector.load %arg1[%c184_32, %c0_33] : memref<200x64xf32, #tpu.memory_space<vmem>>, vector<15x5xf32>
    %148 = vector.extract_strided_slice %147 {offsets = [0, 0], sizes = [15, 2], strides = [1, 1]} : vector<15x5xf32> to vector<15x2xf32>
    %149 = vector.extract_strided_slice %147 {offsets = [0, 2], sizes = [15, 1], strides = [1, 1]} : vector<15x5xf32> to vector<15x1xf32>
    %cst_34 = arith.constant dense<0.000000e+00> : vector<3x21xf32>
    %150 = tpu.matmul %146, %145, %cst_34 {dimension_numbers = #tpu.dot_dimension_numbers<[1], [0], [0], [1], [0, 0, 1, 1], [], []>} : vector<3x15xf32>, vector<15x21xf32>, vector<3x21xf32> -> vector<3x21xf32>
    %151 = vector.extract_strided_slice %150 {offsets = [2, 0], sizes = [1, 21], strides = [1, 1]} : vector<3x21xf32> to vector<1x21xf32>
    %152 = vector.extract_strided_slice %150 {offsets = [0, 0], sizes = [2, 5], strides = [1, 1]} : vector<3x21xf32> to vector<2x5xf32>
    %153 = vector.extract_strided_slice %151 {offsets = [0, 5], sizes = [1, 16], strides = [1, 1]} : vector<1x21xf32> to vector<1x16xf32>
    %cst_35 = arith.constant dense<0.000000e+00> : vector<1x32xf32>
    %154 = tpu.matmul %153, %2, %cst_35 {dimension_numbers = #tpu.dot_dimension_numbers<[1], [0], [0], [1], [0, 0, 1, 1], [], []>} : vector<1x16xf32>, vector<16x32xf32>, vector<1x32xf32> -> vector<1x32xf32>
    %155 = arith.addf %154, %3 : vector<1x32xf32>
    %cst_36 = arith.constant 0.000000e+00 : f32
    %156 = vector.broadcast %cst_36 : f32 to vector<1x32xf32>
    %157 = arith.maximumf %155, %156 : vector<1x32xf32>
    %158 = vector.extract_strided_slice %157 {offsets = [0, 0], sizes = [1, 16], strides = [1, 1]} : vector<1x32xf32> to vector<1x16xf32>
    %159 = vector.extract_strided_slice %157 {offsets = [0, 16], sizes = [1, 16], strides = [1, 1]} : vector<1x32xf32> to vector<1x16xf32>
    %160 = tpu.concatenate %151, %158 in 1 : vector<1x21xf32>, vector<1x16xf32> -> vector<1x37xf32>
    %cst_37 = arith.constant dense<0.000000e+00> : vector<1x64xf32>
    %161 = tpu.matmul %160, %4, %cst_37 {dimension_numbers = #tpu.dot_dimension_numbers<[1], [0], [0], [1], [0, 0, 1, 1], [], []>} : vector<1x37xf32>, vector<37x64xf32>, vector<1x64xf32> -> vector<1x64xf32>
    %162 = arith.addf %161, %5 : vector<1x64xf32>
    %163 = vector.extract_strided_slice %162 {offsets = [0, 0], sizes = [1, 48], strides = [1, 1]} : vector<1x64xf32> to vector<1x48xf32>
    %164 = arith.negf %163 : vector<1x48xf32>
    %165 = math.exp %164 : vector<1x48xf32>
    %cst_38 = arith.constant 1.000000e+00 : f32
    %166 = vector.broadcast %cst_38 : f32 to vector<1x48xf32>
    %167 = arith.addf %166, %165 : vector<1x48xf32>
    %168 = arith.divf %166, %167 : vector<1x48xf32>
    %169 = vector.extract_strided_slice %168 {offsets = [0, 0], sizes = [1, 16], strides = [1, 1]} : vector<1x48xf32> to vector<1x16xf32>
    %170 = vector.extract_strided_slice %168 {offsets = [0, 16], sizes = [1, 16], strides = [1, 1]} : vector<1x48xf32> to vector<1x16xf32>
    %171 = vector.extract_strided_slice %168 {offsets = [0, 32], sizes = [1, 16], strides = [1, 1]} : vector<1x48xf32> to vector<1x16xf32>
    %172 = vector.extract_strided_slice %162 {offsets = [0, 48], sizes = [1, 16], strides = [1, 1]} : vector<1x64xf32> to vector<1x16xf32>
    %173 = math.tanh %172 : vector<1x16xf32>
    %174 = arith.mulf %170, %159 : vector<1x16xf32>
    %175 = arith.mulf %169, %173 : vector<1x16xf32>
    %176 = arith.addf %174, %175 : vector<1x16xf32>
    %177 = math.tanh %176 : vector<1x16xf32>
    %178 = arith.mulf %171, %177 : vector<1x16xf32>
    %cst_39 = arith.constant dense<0.000000e+00> : vector<1x12xf32>
    %179 = tpu.matmul %178, %6, %cst_39 {dimension_numbers = #tpu.dot_dimension_numbers<[1], [0], [0], [1], [0, 0, 1, 1], [], []>} : vector<1x16xf32>, vector<16x12xf32>, vector<1x12xf32> -> vector<1x12xf32>
    %180 = arith.addf %179, %7 : vector<1x12xf32>
    %181 = math.tanh %180 : vector<1x12xf32>
    %182 = arith.negf %180 : vector<1x12xf32>
    %183 = math.exp %182 : vector<1x12xf32>
    %cst_40 = arith.constant 1.000000e+00 : f32
    %184 = vector.broadcast %cst_40 : f32 to vector<1x12xf32>
    %185 = arith.addf %184, %183 : vector<1x12xf32>
    %186 = arith.divf %184, %185 : vector<1x12xf32>
    %187 = arith.select %24, %180, %186 : vector<1x12xi1>, vector<1x12xf32>
    %188 = arith.select %19, %181, %187 : vector<1x12xi1>, vector<1x12xf32>
    %189 = vector.extract_strided_slice %188 {offsets = [0, 0], sizes = [1, 5], strides = [1, 1]} : vector<1x12xf32> to vector<1x5xf32>
    %190 = vector.extract_strided_slice %188 {offsets = [0, 6], sizes = [1, 5], strides = [1, 1]} : vector<1x12xf32> to vector<1x5xf32>
    %191 = tpu.concatenate %189, %190 in 0 : vector<1x5xf32>, vector<1x5xf32> -> vector<2x5xf32>
    %192 = arith.subf %191, %152 : vector<2x5xf32>
    %193 = math.absf %192 : vector<2x5xf32>
    %194 = vector.extract_strided_slice %193 {offsets = [0, 0], sizes = [1, 5], strides = [1, 1]} : vector<2x5xf32> to vector<1x5xf32>
    %195 = vector.shape_cast %194 : vector<1x5xf32> to vector<1x1x5xf32>
    %cst_41 = arith.constant dense<0.000000e+00> : vector<1xf32>
    %196 = vector.multi_reduction <add>, %195, %cst_41 [1, 2] : vector<1x1x5xf32> to vector<1xf32>
    %197 = vector.shape_cast %196 : vector<1xf32> to vector<1x1x1xf32>
    %198 = vector.extract %197[0, 0, 0] : f32 from vector<1x1x1xf32>
    %cst_42 = arith.constant 2.000000e-01 : f32
    %199 = arith.mulf %198, %cst_42 : f32
    %200 = vector.extract_strided_slice %193 {offsets = [1, 0], sizes = [1, 5], strides = [1, 1]} : vector<2x5xf32> to vector<1x5xf32>
    %201 = vector.shape_cast %200 : vector<1x5xf32> to vector<1x1x5xf32>
    %cst_43 = arith.constant dense<0.000000e+00> : vector<1xf32>
    %202 = vector.multi_reduction <add>, %201, %cst_43 [1, 2] : vector<1x1x5xf32> to vector<1xf32>
    %203 = vector.shape_cast %202 : vector<1xf32> to vector<1x1x1xf32>
    %204 = vector.extract %203[0, 0, 0] : f32 from vector<1x1x1xf32>
    %cst_44 = arith.constant 2.000000e-01 : f32
    %205 = arith.mulf %204, %cst_44 : f32
    %206 = vector.broadcast %199 : f32 to vector<1x1xf32>
    %207 = vector.broadcast %205 : f32 to vector<1x1xf32>
    %208 = tpu.concatenate %206, %207 in 1 : vector<1x1xf32>, vector<1x1xf32> -> vector<1x2xf32>
    %209 = arith.addf %199, %205 : f32
    %cst_45 = arith.constant 1.000000e+00 : f32
    %210 = arith.mulf %209, %cst_45 : f32
    %cst_46 = arith.constant 0.000000e+00 : f32
    %211 = arith.addf %cst_46, %210 : f32
    %212 = vector.extract_strided_slice %178 {offsets = [0, 0], sizes = [1, 8], strides = [1, 1]} : vector<1x16xf32> to vector<1x8xf32>
    %213 = vector.extract_strided_slice %176 {offsets = [0, 0], sizes = [1, 8], strides = [1, 1]} : vector<1x16xf32> to vector<1x8xf32>
    %214 = tpu.concatenate %212, %213 in 1 : vector<1x8xf32>, vector<1x8xf32> -> vector<1x16xf32>
    %215 = vector.extract_strided_slice %178 {offsets = [0, 8], sizes = [1, 8], strides = [1, 1]} : vector<1x16xf32> to vector<1x8xf32>
    %216 = vector.extract_strided_slice %176 {offsets = [0, 8], sizes = [1, 8], strides = [1, 1]} : vector<1x16xf32> to vector<1x8xf32>
    %217 = tpu.concatenate %215, %216 in 1 : vector<1x8xf32>, vector<1x8xf32> -> vector<1x16xf32>
    %218 = tpu.concatenate %214, %217 in 0 : vector<1x16xf32>, vector<1x16xf32> -> vector<2x16xf32>
    %219 = vector.extract_strided_slice %151 {offsets = [0, 0], sizes = [1, 5], strides = [1, 1]} : vector<1x21xf32> to vector<1x5xf32>
    %220 = vector.extract_strided_slice %151 {offsets = [0, 0], sizes = [1, 5], strides = [1, 1]} : vector<1x21xf32> to vector<1x5xf32>
    %221 = tpu.concatenate %219, %220 in 0 : vector<1x5xf32>, vector<1x5xf32> -> vector<2x5xf32>
    %222 = vector.extract_strided_slice %152 {offsets = [0, 0], sizes = [2, 2], strides = [1, 1]} : vector<2x5xf32> to vector<2x2xf32>
    %223 = vector.extract_strided_slice %221 {offsets = [0, 2], sizes = [2, 2], strides = [1, 1]} : vector<2x5xf32> to vector<2x2xf32>
    %224 = arith.mulf %222, %223 : vector<2x2xf32>
    %225 = vector.extract_strided_slice %221 {offsets = [0, 0], sizes = [2, 2], strides = [1, 1]} : vector<2x5xf32> to vector<2x2xf32>
    %226 = arith.addf %224, %225 : vector<2x2xf32>
    %227 = vector.extract_strided_slice %152 {offsets = [0, 2], sizes = [2, 2], strides = [1, 1]} : vector<2x5xf32> to vector<2x2xf32>
    %228 = vector.extract_strided_slice %221 {offsets = [0, 2], sizes = [2, 2], strides = [1, 1]} : vector<2x5xf32> to vector<2x2xf32>
    %229 = arith.mulf %227, %228 : vector<2x2xf32>
    %230 = vector.extract_strided_slice %152 {offsets = [0, 4], sizes = [2, 1], strides = [1, 1]} : vector<2x5xf32> to vector<2x1xf32>
    %231 = vector.extract_strided_slice %221 {offsets = [0, 4], sizes = [2, 1], strides = [1, 1]} : vector<2x5xf32> to vector<2x1xf32>
    %232 = arith.addf %230, %231 : vector<2x1xf32>
    %233 = tpu.concatenate %226, %229, %232 in 1 : vector<2x2xf32>, vector<2x2xf32>, vector<2x1xf32> -> vector<2x5xf32>
    %234 = tpu.concatenate %233, %218 in 1 : vector<2x5xf32>, vector<2x16xf32> -> vector<2x21xf32>
    %cst_47 = arith.constant 1.000000e+00 : f32
    %235 = vector.broadcast %cst_47 : f32 to vector<15x1xf32>
    %236 = arith.subf %235, %149 : vector<15x1xf32>
    %237 = vector.broadcast %236 : vector<15x1xf32> to vector<15x21xf32>
    %238 = arith.mulf %145, %237 : vector<15x21xf32>
    %cst_48 = arith.constant dense<0.000000e+00> : vector<15x21xf32>
    %239 = tpu.matmul %148, %234, %cst_48 {dimension_numbers = #tpu.dot_dimension_numbers<[1], [0], [0], [1], [0, 0, 1, 1], [], []>} : vector<15x2xf32>, vector<2x21xf32>, vector<15x21xf32> -> vector<15x21xf32>
    %240 = arith.addf %238, %239 : vector<15x21xf32>
    %c152_49 = arith.constant 152 : index
    %c0_50 = arith.constant 0 : index
    %241 = vector.load %arg1[%c152_49, %c0_50] : memref<200x64xf32, #tpu.memory_space<vmem>>, vector<6x15xf32>
    %c160_51 = arith.constant 160 : index
    %c0_52 = arith.constant 0 : index
    %242 = vector.load %arg1[%c160_51, %c0_52] : memref<200x64xf32, #tpu.memory_space<vmem>>, vector<15x8xf32>
    %243 = vector.extract_strided_slice %242 {offsets = [0, 0], sizes = [15, 4], strides = [1, 1]} : vector<15x8xf32> to vector<15x4xf32>
    %244 = vector.extract_strided_slice %242 {offsets = [0, 4], sizes = [15, 1], strides = [1, 1]} : vector<15x8xf32> to vector<15x1xf32>
    %cst_53 = arith.constant dense<0.000000e+00> : vector<6x21xf32>
    %245 = tpu.matmul %241, %240, %cst_53 {dimension_numbers = #tpu.dot_dimension_numbers<[1], [0], [0], [1], [0, 0, 1, 1], [], []>} : vector<6x15xf32>, vector<15x21xf32>, vector<6x21xf32> -> vector<6x21xf32>
    %246 = vector.extract_strided_slice %245 {offsets = [4, 0], sizes = [2, 21], strides = [1, 1]} : vector<6x21xf32> to vector<2x21xf32>
    %247 = vector.extract_strided_slice %245 {offsets = [0, 0], sizes = [4, 5], strides = [1, 1]} : vector<6x21xf32> to vector<4x5xf32>
    %248 = vector.extract_strided_slice %246 {offsets = [0, 5], sizes = [2, 16], strides = [1, 1]} : vector<2x21xf32> to vector<2x16xf32>
    %cst_54 = arith.constant dense<0.000000e+00> : vector<2x32xf32>
    %249 = tpu.matmul %248, %2, %cst_54 {dimension_numbers = #tpu.dot_dimension_numbers<[1], [0], [0], [1], [0, 0, 1, 1], [], []>} : vector<2x16xf32>, vector<16x32xf32>, vector<2x32xf32> -> vector<2x32xf32>
    %250 = vector.broadcast %3 : vector<1x32xf32> to vector<2x32xf32>
    %251 = arith.addf %249, %250 : vector<2x32xf32>
    %cst_55 = arith.constant 0.000000e+00 : f32
    %252 = vector.broadcast %cst_55 : f32 to vector<2x32xf32>
    %253 = arith.maximumf %251, %252 : vector<2x32xf32>
    %254 = vector.extract_strided_slice %253 {offsets = [0, 0], sizes = [2, 16], strides = [1, 1]} : vector<2x32xf32> to vector<2x16xf32>
    %255 = vector.extract_strided_slice %253 {offsets = [0, 16], sizes = [2, 16], strides = [1, 1]} : vector<2x32xf32> to vector<2x16xf32>
    %256 = tpu.concatenate %246, %254 in 1 : vector<2x21xf32>, vector<2x16xf32> -> vector<2x37xf32>
    %cst_56 = arith.constant dense<0.000000e+00> : vector<2x64xf32>
    %257 = tpu.matmul %256, %4, %cst_56 {dimension_numbers = #tpu.dot_dimension_numbers<[1], [0], [0], [1], [0, 0, 1, 1], [], []>} : vector<2x37xf32>, vector<37x64xf32>, vector<2x64xf32> -> vector<2x64xf32>
    %258 = vector.broadcast %5 : vector<1x64xf32> to vector<2x64xf32>
    %259 = arith.addf %257, %258 : vector<2x64xf32>
    %260 = vector.extract_strided_slice %259 {offsets = [0, 0], sizes = [2, 48], strides = [1, 1]} : vector<2x64xf32> to vector<2x48xf32>
    %261 = arith.negf %260 : vector<2x48xf32>
    %262 = math.exp %261 : vector<2x48xf32>
    %cst_57 = arith.constant 1.000000e+00 : f32
    %263 = vector.broadcast %cst_57 : f32 to vector<2x48xf32>
    %264 = arith.addf %263, %262 : vector<2x48xf32>
    %265 = arith.divf %263, %264 : vector<2x48xf32>
    %266 = vector.extract_strided_slice %265 {offsets = [0, 0], sizes = [2, 16], strides = [1, 1]} : vector<2x48xf32> to vector<2x16xf32>
    %267 = vector.extract_strided_slice %265 {offsets = [0, 16], sizes = [2, 16], strides = [1, 1]} : vector<2x48xf32> to vector<2x16xf32>
    %268 = vector.extract_strided_slice %265 {offsets = [0, 32], sizes = [2, 16], strides = [1, 1]} : vector<2x48xf32> to vector<2x16xf32>
    %269 = vector.extract_strided_slice %259 {offsets = [0, 48], sizes = [2, 16], strides = [1, 1]} : vector<2x64xf32> to vector<2x16xf32>
    %270 = math.tanh %269 : vector<2x16xf32>
    %271 = arith.mulf %267, %255 : vector<2x16xf32>
    %272 = arith.mulf %266, %270 : vector<2x16xf32>
    %273 = arith.addf %271, %272 : vector<2x16xf32>
    %274 = math.tanh %273 : vector<2x16xf32>
    %275 = arith.mulf %268, %274 : vector<2x16xf32>
    %cst_58 = arith.constant dense<0.000000e+00> : vector<2x12xf32>
    %276 = tpu.matmul %275, %6, %cst_58 {dimension_numbers = #tpu.dot_dimension_numbers<[1], [0], [0], [1], [0, 0, 1, 1], [], []>} : vector<2x16xf32>, vector<16x12xf32>, vector<2x12xf32> -> vector<2x12xf32>
    %277 = vector.broadcast %7 : vector<1x12xf32> to vector<2x12xf32>
    %278 = arith.addf %276, %277 : vector<2x12xf32>
    %279 = math.tanh %278 : vector<2x12xf32>
    %280 = arith.negf %278 : vector<2x12xf32>
    %281 = math.exp %280 : vector<2x12xf32>
    %cst_59 = arith.constant 1.000000e+00 : f32
    %282 = vector.broadcast %cst_59 : f32 to vector<2x12xf32>
    %283 = arith.addf %282, %281 : vector<2x12xf32>
    %284 = arith.divf %282, %283 : vector<2x12xf32>
    %285 = vector.shape_cast %24 : vector<1x12xi1> to vector<1x12xi1>
    %286 = vector.broadcast %285 : vector<1x12xi1> to vector<2x12xi1>
    %287 = arith.select %286, %278, %284 : vector<2x12xi1>, vector<2x12xf32>
    %288 = vector.shape_cast %19 : vector<1x12xi1> to vector<1x12xi1>
    %289 = vector.broadcast %288 : vector<1x12xi1> to vector<2x12xi1>
    %290 = arith.select %289, %279, %287 : vector<2x12xi1>, vector<2x12xf32>
    %291 = vector.extract_strided_slice %290 {offsets = [0, 0], sizes = [2, 5], strides = [1, 1]} : vector<2x12xf32> to vector<2x5xf32>
    %292 = vector.extract_strided_slice %290 {offsets = [0, 6], sizes = [2, 5], strides = [1, 1]} : vector<2x12xf32> to vector<2x5xf32>
    %293 = tpu.concatenate %291, %292 in 0 : vector<2x5xf32>, vector<2x5xf32> -> vector<4x5xf32>
    %294 = arith.subf %293, %247 : vector<4x5xf32>
    %295 = math.absf %294 : vector<4x5xf32>
    %296 = vector.extract_strided_slice %295 {offsets = [0, 0], sizes = [2, 5], strides = [1, 1]} : vector<4x5xf32> to vector<2x5xf32>
    %297 = vector.shape_cast %296 : vector<2x5xf32> to vector<1x2x5xf32>
    %cst_60 = arith.constant dense<0.000000e+00> : vector<1xf32>
    %298 = vector.multi_reduction <add>, %297, %cst_60 [1, 2] : vector<1x2x5xf32> to vector<1xf32>
    %299 = vector.shape_cast %298 : vector<1xf32> to vector<1x1x1xf32>
    %300 = vector.extract %299[0, 0, 0] : f32 from vector<1x1x1xf32>
    %cst_61 = arith.constant 1.000000e-01 : f32
    %301 = arith.mulf %300, %cst_61 : f32
    %302 = vector.extract_strided_slice %295 {offsets = [2, 0], sizes = [2, 5], strides = [1, 1]} : vector<4x5xf32> to vector<2x5xf32>
    %303 = vector.shape_cast %302 : vector<2x5xf32> to vector<1x2x5xf32>
    %cst_62 = arith.constant dense<0.000000e+00> : vector<1xf32>
    %304 = vector.multi_reduction <add>, %303, %cst_62 [1, 2] : vector<1x2x5xf32> to vector<1xf32>
    %305 = vector.shape_cast %304 : vector<1xf32> to vector<1x1x1xf32>
    %306 = vector.extract %305[0, 0, 0] : f32 from vector<1x1x1xf32>
    %cst_63 = arith.constant 1.000000e-01 : f32
    %307 = arith.mulf %306, %cst_63 : f32
    %308 = vector.broadcast %301 : f32 to vector<1x1xf32>
    %309 = vector.broadcast %307 : f32 to vector<1x1xf32>
    %310 = tpu.concatenate %308, %309 in 1 : vector<1x1xf32>, vector<1x1xf32> -> vector<1x2xf32>
    %311 = arith.addf %301, %307 : f32
    %cst_64 = arith.constant 1.000000e+00 : f32
    %312 = arith.mulf %311, %cst_64 : f32
    %313 = arith.addf %211, %312 : f32
    %314 = vector.extract_strided_slice %275 {offsets = [0, 0], sizes = [2, 8], strides = [1, 1]} : vector<2x16xf32> to vector<2x8xf32>
    %315 = vector.extract_strided_slice %273 {offsets = [0, 0], sizes = [2, 8], strides = [1, 1]} : vector<2x16xf32> to vector<2x8xf32>
    %316 = tpu.concatenate %314, %315 in 1 : vector<2x8xf32>, vector<2x8xf32> -> vector<2x16xf32>
    %317 = vector.extract_strided_slice %275 {offsets = [0, 8], sizes = [2, 8], strides = [1, 1]} : vector<2x16xf32> to vector<2x8xf32>
    %318 = vector.extract_strided_slice %273 {offsets = [0, 8], sizes = [2, 8], strides = [1, 1]} : vector<2x16xf32> to vector<2x8xf32>
    %319 = tpu.concatenate %317, %318 in 1 : vector<2x8xf32>, vector<2x8xf32> -> vector<2x16xf32>
    %320 = tpu.concatenate %316, %319 in 0 : vector<2x16xf32>, vector<2x16xf32> -> vector<4x16xf32>
    %321 = vector.extract_strided_slice %246 {offsets = [0, 0], sizes = [2, 5], strides = [1, 1]} : vector<2x21xf32> to vector<2x5xf32>
    %322 = vector.extract_strided_slice %246 {offsets = [0, 0], sizes = [2, 5], strides = [1, 1]} : vector<2x21xf32> to vector<2x5xf32>
    %323 = tpu.concatenate %321, %322 in 0 : vector<2x5xf32>, vector<2x5xf32> -> vector<4x5xf32>
    %324 = vector.extract_strided_slice %247 {offsets = [0, 0], sizes = [4, 2], strides = [1, 1]} : vector<4x5xf32> to vector<4x2xf32>
    %325 = vector.extract_strided_slice %323 {offsets = [0, 2], sizes = [4, 2], strides = [1, 1]} : vector<4x5xf32> to vector<4x2xf32>
    %326 = arith.mulf %324, %325 : vector<4x2xf32>
    %327 = vector.extract_strided_slice %323 {offsets = [0, 0], sizes = [4, 2], strides = [1, 1]} : vector<4x5xf32> to vector<4x2xf32>
    %328 = arith.addf %326, %327 : vector<4x2xf32>
    %329 = vector.extract_strided_slice %247 {offsets = [0, 2], sizes = [4, 2], strides = [1, 1]} : vector<4x5xf32> to vector<4x2xf32>
    %330 = vector.extract_strided_slice %323 {offsets = [0, 2], sizes = [4, 2], strides = [1, 1]} : vector<4x5xf32> to vector<4x2xf32>
    %331 = arith.mulf %329, %330 : vector<4x2xf32>
    %332 = vector.extract_strided_slice %247 {offsets = [0, 4], sizes = [4, 1], strides = [1, 1]} : vector<4x5xf32> to vector<4x1xf32>
    %333 = vector.extract_strided_slice %323 {offsets = [0, 4], sizes = [4, 1], strides = [1, 1]} : vector<4x5xf32> to vector<4x1xf32>
    %334 = arith.addf %332, %333 : vector<4x1xf32>
    %335 = tpu.concatenate %328, %331, %334 in 1 : vector<4x2xf32>, vector<4x2xf32>, vector<4x1xf32> -> vector<4x5xf32>
    %336 = tpu.concatenate %335, %320 in 1 : vector<4x5xf32>, vector<4x16xf32> -> vector<4x21xf32>
    %cst_65 = arith.constant 1.000000e+00 : f32
    %337 = vector.broadcast %cst_65 : f32 to vector<15x1xf32>
    %338 = arith.subf %337, %244 : vector<15x1xf32>
    %339 = vector.broadcast %338 : vector<15x1xf32> to vector<15x21xf32>
    %340 = arith.mulf %240, %339 : vector<15x21xf32>
    %cst_66 = arith.constant dense<0.000000e+00> : vector<15x21xf32>
    %341 = tpu.matmul %243, %336, %cst_66 {dimension_numbers = #tpu.dot_dimension_numbers<[1], [0], [0], [1], [0, 0, 1, 1], [], []>} : vector<15x4xf32>, vector<4x21xf32>, vector<15x21xf32> -> vector<15x21xf32>
    %342 = arith.addf %340, %341 : vector<15x21xf32>
    %c120_67 = arith.constant 120 : index
    %c0_68 = arith.constant 0 : index
    %343 = vector.load %arg1[%c120_67, %c0_68] : memref<200x64xf32, #tpu.memory_space<vmem>>, vector<12x15xf32>
    %cst_69 = arith.constant dense<0.000000e+00> : vector<12x21xf32>
    %344 = tpu.matmul %343, %342, %cst_69 {dimension_numbers = #tpu.dot_dimension_numbers<[1], [0], [0], [1], [0, 0, 1, 1], [], []>} : vector<12x15xf32>, vector<15x21xf32>, vector<12x21xf32> -> vector<12x21xf32>
    %345 = vector.extract_strided_slice %344 {offsets = [8, 0], sizes = [4, 21], strides = [1, 1]} : vector<12x21xf32> to vector<4x21xf32>
    %346 = vector.extract_strided_slice %344 {offsets = [0, 0], sizes = [8, 5], strides = [1, 1]} : vector<12x21xf32> to vector<8x5xf32>
    %347 = vector.extract_strided_slice %345 {offsets = [0, 5], sizes = [4, 16], strides = [1, 1]} : vector<4x21xf32> to vector<4x16xf32>
    %cst_70 = arith.constant dense<0.000000e+00> : vector<4x32xf32>
    %348 = tpu.matmul %347, %2, %cst_70 {dimension_numbers = #tpu.dot_dimension_numbers<[1], [0], [0], [1], [0, 0, 1, 1], [], []>} : vector<4x16xf32>, vector<16x32xf32>, vector<4x32xf32> -> vector<4x32xf32>
    %349 = vector.broadcast %3 : vector<1x32xf32> to vector<4x32xf32>
    %350 = arith.addf %348, %349 : vector<4x32xf32>
    %cst_71 = arith.constant 0.000000e+00 : f32
    %351 = vector.broadcast %cst_71 : f32 to vector<4x32xf32>
    %352 = arith.maximumf %350, %351 : vector<4x32xf32>
    %353 = vector.extract_strided_slice %352 {offsets = [0, 0], sizes = [4, 16], strides = [1, 1]} : vector<4x32xf32> to vector<4x16xf32>
    %354 = vector.extract_strided_slice %352 {offsets = [0, 16], sizes = [4, 16], strides = [1, 1]} : vector<4x32xf32> to vector<4x16xf32>
    %355 = tpu.concatenate %345, %353 in 1 : vector<4x21xf32>, vector<4x16xf32> -> vector<4x37xf32>
    %cst_72 = arith.constant dense<0.000000e+00> : vector<4x64xf32>
    %356 = tpu.matmul %355, %4, %cst_72 {dimension_numbers = #tpu.dot_dimension_numbers<[1], [0], [0], [1], [0, 0, 1, 1], [], []>} : vector<4x37xf32>, vector<37x64xf32>, vector<4x64xf32> -> vector<4x64xf32>
    %357 = vector.broadcast %5 : vector<1x64xf32> to vector<4x64xf32>
    %358 = arith.addf %356, %357 : vector<4x64xf32>
    %359 = vector.extract_strided_slice %358 {offsets = [0, 0], sizes = [4, 48], strides = [1, 1]} : vector<4x64xf32> to vector<4x48xf32>
    %360 = arith.negf %359 : vector<4x48xf32>
    %361 = math.exp %360 : vector<4x48xf32>
    %cst_73 = arith.constant 1.000000e+00 : f32
    %362 = vector.broadcast %cst_73 : f32 to vector<4x48xf32>
    %363 = arith.addf %362, %361 : vector<4x48xf32>
    %364 = arith.divf %362, %363 : vector<4x48xf32>
    %365 = vector.extract_strided_slice %364 {offsets = [0, 0], sizes = [4, 16], strides = [1, 1]} : vector<4x48xf32> to vector<4x16xf32>
    %366 = vector.extract_strided_slice %364 {offsets = [0, 16], sizes = [4, 16], strides = [1, 1]} : vector<4x48xf32> to vector<4x16xf32>
    %367 = vector.extract_strided_slice %364 {offsets = [0, 32], sizes = [4, 16], strides = [1, 1]} : vector<4x48xf32> to vector<4x16xf32>
    %368 = vector.extract_strided_slice %358 {offsets = [0, 48], sizes = [4, 16], strides = [1, 1]} : vector<4x64xf32> to vector<4x16xf32>
    %369 = math.tanh %368 : vector<4x16xf32>
    %370 = arith.mulf %366, %354 : vector<4x16xf32>
    %371 = arith.mulf %365, %369 : vector<4x16xf32>
    %372 = arith.addf %370, %371 : vector<4x16xf32>
    %373 = math.tanh %372 : vector<4x16xf32>
    %374 = arith.mulf %367, %373 : vector<4x16xf32>
    %cst_74 = arith.constant dense<0.000000e+00> : vector<4x12xf32>
    %375 = tpu.matmul %374, %6, %cst_74 {dimension_numbers = #tpu.dot_dimension_numbers<[1], [0], [0], [1], [0, 0, 1, 1], [], []>} : vector<4x16xf32>, vector<16x12xf32>, vector<4x12xf32> -> vector<4x12xf32>
    %376 = vector.broadcast %7 : vector<1x12xf32> to vector<4x12xf32>
    %377 = arith.addf %375, %376 : vector<4x12xf32>
    %378 = math.tanh %377 : vector<4x12xf32>
    %379 = arith.negf %377 : vector<4x12xf32>
    %380 = math.exp %379 : vector<4x12xf32>
    %cst_75 = arith.constant 1.000000e+00 : f32
    %381 = vector.broadcast %cst_75 : f32 to vector<4x12xf32>
    %382 = arith.addf %381, %380 : vector<4x12xf32>
    %383 = arith.divf %381, %382 : vector<4x12xf32>
    %384 = vector.shape_cast %24 : vector<1x12xi1> to vector<1x12xi1>
    %385 = vector.broadcast %384 : vector<1x12xi1> to vector<4x12xi1>
    %386 = arith.select %385, %377, %383 : vector<4x12xi1>, vector<4x12xf32>
    %387 = vector.shape_cast %19 : vector<1x12xi1> to vector<1x12xi1>
    %388 = vector.broadcast %387 : vector<1x12xi1> to vector<4x12xi1>
    %389 = arith.select %388, %378, %386 : vector<4x12xi1>, vector<4x12xf32>
    %390 = vector.extract_strided_slice %389 {offsets = [0, 0], sizes = [4, 5], strides = [1, 1]} : vector<4x12xf32> to vector<4x5xf32>
    %391 = vector.extract_strided_slice %389 {offsets = [0, 6], sizes = [4, 5], strides = [1, 1]} : vector<4x12xf32> to vector<4x5xf32>
    %392 = tpu.concatenate %390, %391 in 0 : vector<4x5xf32>, vector<4x5xf32> -> vector<8x5xf32>
    %393 = arith.subf %392, %346 : vector<8x5xf32>
    %394 = math.absf %393 : vector<8x5xf32>
    %395 = vector.extract_strided_slice %394 {offsets = [0, 0], sizes = [4, 5], strides = [1, 1]} : vector<8x5xf32> to vector<4x5xf32>
    %396 = vector.shape_cast %395 : vector<4x5xf32> to vector<1x4x5xf32>
    %cst_76 = arith.constant dense<0.000000e+00> : vector<1xf32>
    %397 = vector.multi_reduction <add>, %396, %cst_76 [1, 2] : vector<1x4x5xf32> to vector<1xf32>
    %398 = vector.shape_cast %397 : vector<1xf32> to vector<1x1x1xf32>
    %399 = vector.extract %398[0, 0, 0] : f32 from vector<1x1x1xf32>
    %cst_77 = arith.constant 5.000000e-02 : f32
    %400 = arith.mulf %399, %cst_77 : f32
    %401 = vector.extract_strided_slice %394 {offsets = [4, 0], sizes = [4, 5], strides = [1, 1]} : vector<8x5xf32> to vector<4x5xf32>
    %402 = vector.shape_cast %401 : vector<4x5xf32> to vector<1x4x5xf32>
    %cst_78 = arith.constant dense<0.000000e+00> : vector<1xf32>
    %403 = vector.multi_reduction <add>, %402, %cst_78 [1, 2] : vector<1x4x5xf32> to vector<1xf32>
    %404 = vector.shape_cast %403 : vector<1xf32> to vector<1x1x1xf32>
    %405 = vector.extract %404[0, 0, 0] : f32 from vector<1x1x1xf32>
    %cst_79 = arith.constant 5.000000e-02 : f32
    %406 = arith.mulf %405, %cst_79 : f32
    %407 = vector.broadcast %400 : f32 to vector<1x1xf32>
    %408 = vector.broadcast %406 : f32 to vector<1x1xf32>
    %409 = tpu.concatenate %407, %408 in 1 : vector<1x1xf32>, vector<1x1xf32> -> vector<1x2xf32>
    %410 = arith.addf %400, %406 : f32
    %cst_80 = arith.constant 1.000000e+00 : f32
    %411 = arith.mulf %410, %cst_80 : f32
    %412 = arith.addf %313, %411 : f32
    %413 = tpu.concatenate %208, %310, %409 in 0 : vector<1x2xf32>, vector<1x2xf32>, vector<1x2xf32> -> vector<3x2xf32>
    %c0_81 = arith.constant 0 : index
    %c0_82 = arith.constant 0 : index
    %414 = vector.load %arg2[%c0_81, %c0_82] : memref<3x2xf32, #tpu.memory_space<vmem>>, vector<3x2xf32>
    tpu.vector_store %arg2[%c0_81, %c0_82], %413 {strides = array<i32>} : memref<3x2xf32, #tpu.memory_space<vmem>>, vector<3x2xf32>,
    %cst_83 = arith.constant 0.333333343 : f32
    %415 = arith.mulf %412, %cst_83 : f32
    %416 = vector.broadcast %415 : f32 to vector<1x1xf32>
    %c0_84 = arith.constant 0 : index
    %c0_85 = arith.constant 0 : index
    %417 = vector.load %arg3[%c0_84, %c0_85] : memref<1x1xf32, #tpu.memory_space<vmem>>, vector<1x1xf32>
    tpu.vector_store %arg3[%c0_84, %c0_85], %416 {strides = array<i32>} : memref<1x1xf32, #tpu.memory_space<vmem>>, vector<1x1xf32>,
    return
  }
}

</mosaic_0001>

<bundles_post_ra>
// kernel: fwd.1
= control target key start
LH: loop header
LB: loop body
LE: loop exit
PB: predicated region body
PF: predicated region fallthrough
CT: control target
= control target key end

     0   :  { %9 = vsyncpa [#allocation3], 0  ;;  %s2018_s0 = inlined_call_operand.vmem [shape: f32[15,21], index: 0, kind: input, shape index: {}]   ;;  %s2019_s1 = inlined_call_operand.hbm [shape: f32[200,64], index: 1, kind: input, shape index: {}]   ;;  %s2020_s2 = inlined_call_operand.vmem [shape: f32[3,2], index: 2, kind: output, shape index: {0}]   ;;  %s2021_s3 = inlined_call_operand.hbm [shape: f32[1,1], index: 3, kind: output, shape index: {1}]  }
   0x1   :  { %10 = vsyncpa [#allocation4], 0  ;;  %s17_s14 = sshll.u32 %s2019_s1, 4  ;;  %s1609_s15 = smov [#allocation2]   ;;  %s18_s14 = int_to_ptr.hbm [resolvable:$true] %s17_s14 }
   0x2   :  { %s19_s16 = sshll.u32 %s1609_s15, 4  ;;  %s1610_s17 = smov 128   ;;  %s20_s16 = int_to_ptr.vmem [resolvable:$true] %s19_s16 }
   0x3   :  { %s1611_s18 = smov 8  }
   0x4   :  { %25 = dma.hbm_to_vmem [thread:$0]  %s18_s14, 3200, %s20_s16, [#allocation3], %s1610_s17, %s1610_s17, %s1611_s18  }
   0x5   :  { %1605 = dma.done.wait [#allocation3], 3200  }
   0x6   :  { %1606 = vsyncadd [#allocation3], 4294964096  ;;  %vm70_vm0 = vcmask 1046528   ;;  %vm102_vm1 = vcmask 1044480   ;;  %v1659_v0 = vld [vmem:[%s2018_s0 + $0x8] sm:$0x7f] }
   0x7   :  { %v1664_v1 = vld [vmem:[%s2018_s0] sm:$0xff]  ;;  %1387 = vmatpush.msk.msra.mxu0 %vm70_vm0, %v1659_v0  ;;  %v1668_v2 = vld [vmem:[#allocation2 + $0x78] sm:$0xff]  ;;  %vm63_vm2 = vcmask 121856   ;;  %v31_v3 = vld [vmem:[#allocation2 + $0x8] sm:$0x1f]  ;;  %vm98_vm3 = vcmask 105472  }
   0x8   :  { %1390 = vmatpush.msk.msra.mxu1 %vm102_vm1, %v31_v3  ;;  %v30_v4 = vld [vmem:[#allocation2] sm:$0xff]  ;;  %v1677_v6 = vld [vmem:[#allocation2 + $0x10] ss:$0 sm:$0xff]  ;;  %s1612_s0 = smov 104   ;;  %s1613_s1 = smov 123   ;;  %v61_v26 = vld [vmem:[#allocation2 + $0x88] sm:$0xff] }
   0x9   :  { %89 = vmatpush.msra.mxu0 %v1664_v1  ;;  %v1683_v25 = vld [vmem:[#allocation2 + $0x80] sm:$0xf]  ;;  %s1614_s23 = smov 119   ;;  %v62_v32 = vld [vmem:[#allocation2 + $0x90] sm:$0x7f]  ;;  %s1615_s24 = smov 117  }
   0xa   :  { %1388 = vmatmul.msk.f32.vlgmr.msra.gmra.mxu0 %vm63_vm2, %v1668_v2  ;;  %121 = vmatpush.msra.mxu1 %v30_v4  ;;  %s1616_s25 = smov 5   ;;  %v185_v39 = vsub.f32 1.0, %v61_v26  ;;  %v186_v40 = vsub.f32 1.0, %v62_v32  ;;  %v1617_v41 = vmov 13   ;;  %vm182_vm8 = vcmask 39936   ;;  %s1620_s26 = smov 125  }
   0xb   :  { %1406 = vmatpush.msk.msrb.mxu0 %vm102_vm1, %v31_v3  ;;  %1479 = vset.pattern.permute.xlu0 %v1617_v41  ;;  %vm2023_vm9 = vcmask 1043456   ;;  %vm205_vm10 = vcmask 31744   ;;  %v1703_v57 = vld [vmem:[#allocation2 + $0x98] sm:$0x3f]  ;;  %vm378_vm15 = vcmask 1041408   ;;  %s1621_s27 = smov 21  }
   0xc   :  { %1398 = vmatpush.msk.msrb.mxu1 %vm102_vm1, %v31_v3  ;;  %1478 = vset.pattern.permute.xlu2 %v1617_v41  ;;  %s1622_s28 = smov 80   ;;  %s1623_s29 = smov 16  }
   0xd   :  { %453 = vmatpush.msrb.mxu0 %v30_v4  ;;  %s1625_s30 = smov 112   ;;  %s1626_s4 = smov 126  }
   0xe   :  { %286 = vmatpush.msrb.mxu1 %v30_v4  ;;  %s1627_s5 = smov 96   ;;  %s1628_s6 = smov 88  }
   0xf   :  { %s1629_s7 = smov 120   ;;  %s1630_s8 = smov 122  }
  0x12   :  { %1389 = vmatmul.msk.f32.gmra.mxu0 %vm63_vm2, %v1683_v25 }
  0x87   :  { %v91_v5 = vpop.f32.mrf.mxu0 }
  0x88   :  { %1391 = vmatmul.msk.f32.vlgmr.msra.gmra.mxu1 %vm98_vm3, %v91_v5 }
  0x8f   :  { %v94_v43 = vpop.f32.mrf.mxu0 }
 0x105   :  { %v123_v7 = vpop.f32.mrf.mxu1 }
 0x106   :  { %v124_v8 = vadd.f32 %v1677_v6, %v123_v7 }
 0x108   :  { %1491 = vtanh.f32 %v124_v8  ;;  %v1392_v10 = vmul.f32 -1.442695, %v124_v8 }
 0x10a   :  { %1493 = vpow2.f32 %v1392_v10 }
 0x10e   :  { %v1492_v9 = vpop.eup %1491 }
 0x10f   :  { %151 = vrot.lane.b32.xlu0 %v1492_v9, %s1612_s0 }
 0x110   :  { %v1494_v11 = vpop.eup %1493 }
 0x111   :  { %v129_v12 = vadd.f32 1.0, %v1494_v11 }
 0x113   :  { %1495 = vrcp.f32 %v129_v12  ;;  %v141_v18 = vand.u32 2147483648, %v129_v12  ;;  %vm135_vm5 = vweird.f32 %v129_v12  ;;  %v139_v19 = vand.u32 2147483647, %v129_v12 }
 0x115   :  { %v142_v21 = vor.u32 1.1754944e-38, %v141_v18  ;;  %vm140_vm7 = vcmp.eq.f32.partialorder %v139_v19, 8.507059e+37 }
 0x117   :  { %146 = vrot.lane.b32.xlu0 %v91_v5, %s1613_s1 }
 0x119   :  { %v1496_v13 = vpop.eup %1495 }
 0x11a   :  { %v131_v14 = vmul.f32 %v1496_v13, %v129_v12  ;;  %vm136_vm4 = vweird.f32 %v1496_v13 }
 0x11b   :  { %vm137_vm6 = vmor %vm135_vm5, %vm136_vm4  ;;  %vm373_vm4 = vcmask 15360  }
 0x11c   :  { %v132_v15 = vsub.f32 1.0, %v131_v14 }
 0x11e   :  { %v133_v16 = vmul.f32 %v1496_v13, %v132_v15  ;;  %v1618_v15 = vmov 7  }
 0x11f   :  { %201 = vrot.lane.b32.xlu0 %v61_v26, %s1614_s23  ;;  %1480 = vset.pattern.permute.xlu1 %v1618_v15 }
 0x120   :  { %v134_v17 = vadd.f32 %v1496_v13, %v133_v16 }
 0x122   :  { %v138_v20 = vsel %vm137_vm6, %v1496_v13, %v134_v17 }
 0x123   :  { %v143_v23 = vsel %vm140_vm7, %v142_v21, %v138_v20 }
 0x127   :  { %189 = vperm.xlu0 %1479, %v185_v39  }
 0x181   :  { %v152_v22 = vpop.permute.xlu0 %151 }
 0x182   :  { %v154_v24 = vmul.f32 %v152_v22, %v143_v23 }
 0x184   :  { %156 = vrot.lane.b32.xlu1 %v154_v24, %s1611_s18  ;;  %v1715_v24 = vld [vmem:[#allocation2 + $0xa8] sm:$0x7f] }
 0x185   :  { %v352_v26 = vsub.f32 1.0, %v1715_v24 }
 0x189   :  { %v147_v27 = vpop.permute.xlu0 %146 }
 0x18a   :  { %v149_v28 = vmul.f32 %v147_v27, %v143_v23  ;;  %v1718_v27 = vld [vmem:[#allocation2 + $0xa0] sm:$0xff] }
 0x191   :  { %v202_v46 = vpop.permute.xlu0 %201 }
 0x199   :  { %v190_v51 = vpop.permute.xlu0 %189 }
 0x19a   :  { %v197_v53 = vmul.f32 %v190_v51, %v1664_v1 }
 0x1f6   :  { %v157_v29 = vpop.permute.xlu1 %156 }
 0x1f7   :  { %v159_v30 = vadd.f32 %v157_v29, %v149_v28  ;;  %v351_v28 = vsub.f32 1.0, %v1718_v27 }
 0x1f9   :  { %1497 = vtanh.f32 %v159_v30  ;;  %v171_v37 = vrot.slane %v159_v30, 4 }
 0x1fb   :  { %v173_v38 = vadd.f32 %v171_v37, %v159_v30 }
 0x1ff   :  { %v1498_v31 = vpop.eup %1497 }
 0x200   :  { %162 = vrot.lane.b32.xlu1 %v1498_v31, %s1611_s18 }
 0x208   :  { %203 = vrot.lane.b32.xlu1 %v62_v32, %s1614_s23  ;;  %s1631_s23 = smov [#allocation5]  }
 0x272   :  { %v163_v33 = vpop.permute.xlu1 %162 }
 0x273   :  { %v165_v34 = vmul.f32 %v163_v33, %v143_v23 }
 0x275   :  { %v167_v35 = vrot.slane %v165_v34, 4 }
 0x277   :  { %v169_v36 = vadd.f32 %v167_v35, %v165_v34 }
 0x279   :  { %175 = vrot.lane.b32.xlu2 %v169_v36, %s1615_s24 }
 0x27a   :  { %v204_v48 = vpop.permute.xlu1 %203 }
 0x281   :  { %179 = vrot.lane.b32.xlu2 %v173_v38, %s1616_s25 }
 0x289   :  { %194 = vperm.xlu2 %1478, %v186_v40  }
 0x291   :  { %1481 = vset.pattern.permute.xlu2 %v1618_v15 }
 0x2d3   :  { %v176_v42 = vpop.permute.xlu2 %175 }
 0x2d4   :  { %v183_v44 = vsel %vm182_vm8, %v94_v43, %v176_v42 }
 0x2db   :  { %v180_v45 = vpop.permute.xlu2 %179 }
 0x2dc   :  { %v184_v47 = vsel %vm98_vm3, %v183_v44, %v180_v45 }
 0x2dd   :  { %1393 = vmatpush.msk.msra.mxu2 %vm2023_vm9, %v184_v47 }
 0x2de   :  { %1394 = vmatmul.msk.f32.vlgmr.msra.gmra.mxu2 %vm205_vm10, %v202_v46 }
 0x2e3   :  { %v195_v50 = vpop.permute.xlu2 %194 }
 0x2e4   :  { %v198_v52 = vmul.f32 %v195_v50, %v1659_v0 }
 0x2e6   :  { %1395 = vmatmul.msk.f32.gmra.mxu2 %vm205_vm10, %v204_v48 }
 0x361   :  { %v231_v49 = vpop.f32.mrf.mxu2 }
 0x362   :  { %v1699_v56 = vadd.f32 %v231_v49, %v197_v53  ;;  %v1743_v49 = vld [vmem:[#allocation2 + $0xb0] sm:$0x7] }
 0x369   :  { %v234_v54 = vpop.f32.mrf.mxu2 }
 0x36a   :  { %v1697_v55 = vadd.f32 %v234_v54, %v198_v52 }
 0x36c   :  { %1396 = vmatpush.msk.msra.mxu3 %vm70_vm0, %v1697_v55 }
 0x36e   :  { %263 = vmatpush.msra.mxu3 %v1699_v56 }
 0x36f   :  { %1397 = vmatmul.msk.f32.vlgmr.msra.gmra.mxu3 %vm63_vm2, %v1703_v57 }
 0x3f2   :  { %v265_v58 = vpop.f32.mrf.mxu3 }
 0x3f3   :  { %311 = vrot.lane.b32.xlu2 %v265_v58, %s1613_s1  ;;  %1399 = vmatmul.msk.f32.vlgmr.msrb.gmra.mxu1 %vm98_vm3, %v265_v58 }
 0x44d   :  { %v312_v16 = vpop.permute.xlu2 %311 }
 0x470   :  { %v288_v59 = vpop.f32.mrf.mxu1 }
 0x471   :  { %v289_v60 = vadd.f32 %v1677_v6, %v288_v59 }
 0x473   :  { %1499 = vtanh.f32 %v289_v60  ;;  %v1400_v62 = vmul.f32 -1.442695, %v289_v60 }
 0x475   :  { %1501 = vpow2.f32 %v1400_v62 }
 0x479   :  { %v1500_v61 = vpop.eup %1499 }
 0x47a   :  { %316 = vrot.lane.b32.xlu1 %v1500_v61, %s1612_s0 }
 0x47b   :  { %v1502_v63 = vpop.eup %1501 }
 0x47c   :  { %v294_v0 = vadd.f32 1.0, %v1502_v63 }
 0x47e   :  { %1503 = vrcp.f32 %v294_v0  ;;  %v306_v8 = vand.u32 2147483648, %v294_v0  ;;  %vm300_vm12 = vweird.f32 %v294_v0  ;;  %v304_v9 = vand.u32 2147483647, %v294_v0 }
 0x480   :  { %v307_v11 = vor.u32 1.1754944e-38, %v306_v8  ;;  %vm305_vm14 = vcmp.eq.f32.partialorder %v304_v9, 8.507059e+37 }
 0x484   :  { %v1504_v1 = vpop.eup %1503 }
 0x485   :  { %v296_v3 = vmul.f32 %v1504_v1, %v294_v0  ;;  %vm301_vm11 = vweird.f32 %v1504_v1 }
 0x486   :  { %vm302_vm13 = vmor %vm300_vm12, %vm301_vm11  ;;  %vm545_vm12 = vcmask 1040384  }
 0x487   :  { %v297_v4 = vsub.f32 1.0, %v296_v3 }
 0x489   :  { %v298_v5 = vmul.f32 %v1504_v1, %v297_v4 }
 0x48b   :  { %v299_v7 = vadd.f32 %v1504_v1, %v298_v5 }
 0x48d   :  { %v303_v10 = vsel %vm302_vm13, %v1504_v1, %v299_v7  ;;  %v1619_v7 = vmov 4   ;;  %vm2022_vm13 = vcmask 7168  }
 0x48e   :  { %v308_v13 = vsel %vm305_vm14, %v307_v11, %v303_v10  ;;  %1483 = vset.pattern.permute.xlu0 %v1619_v7  ;;  %vm629_vm14 = vcmask 171008  }
 0x48f   :  { %v314_v17 = vmul.f32 %v312_v16, %v308_v13  ;;  %v1757_v16 = vld [vmem:[#allocation2 + $0xc0] sm:$0x7f] }
 0x4ec   :  { %v317_v12 = vpop.permute.xlu1 %316 }
 0x4ed   :  { %v319_v14 = vmul.f32 %v317_v12, %v308_v13 }
 0x4ef   :  { %321 = vrot.lane.b32.xlu1 %v319_v14, %s1611_s18 }
 0x561   :  { %v322_v18 = vpop.permute.xlu1 %321 }
 0x562   :  { %v324_v19 = vadd.f32 %v322_v18, %v314_v17  ;;  %v519_v17 = vsub.f32 1.0, %v1757_v16  ;;  %v1760_v18 = vld [vmem:[#allocation2 + $0xb8] sm:$0xff] }
 0x564   :  { %1505 = vtanh.f32 %v324_v19  ;;  %v336_v20 = vrot.slane %v324_v19, 2 }
 0x566   :  { %v338_v21 = vadd.f32 %v336_v20, %v324_v19  ;;  %v518_v19 = vsub.f32 1.0, %v1760_v18 }
 0x568   :  { %v345_v22 = vrot.slane %v338_v21, 4 }
 0x56a   :  { %v1506_v23 = vpop.eup %1505  ;;  %346 = vrot.lane.b32.xlu1 %v345_v22, %s1616_s25 }
 0x56b   :  { %327 = vrot.lane.b32.xlu2 %v1506_v23, %s1611_s18 }
 0x572   :  { %360 = vperm.xlu1 %1480, %v352_v26  }
 0x573   :  { %367 = vrot.lane.b32.xlu2 %v1718_v27, %s1613_s1 }
 0x57b   :  { %355 = vperm.xlu2 %1481, %v351_v28  }
 0x583   :  { %1482 = vset.pattern.permute.xlu2 %v1619_v7 }
 0x5c5   :  { %v328_v29 = vpop.permute.xlu2 %327 }
 0x5c6   :  { %v330_v30 = vmul.f32 %v328_v29, %v308_v13 }
 0x5c8   :  { %v332_v31 = vrot.slane %v330_v30, 2 }
 0x5ca   :  { %v334_v32 = vadd.f32 %v332_v31, %v330_v30 }
 0x5cc   :  { %v340_v33 = vrot.slane %v334_v32, 4 }
 0x5cd   :  { %v368_v39 = vpop.permute.xlu2 %367 }
 0x5ce   :  { %341 = vrot.lane.b32.xlu0 %v340_v33, %s1615_s24 }
 0x5d5   :  { %v356_v43 = vpop.permute.xlu2 %355 }
 0x5d6   :  { %369 = vrot.lane.b32.xlu0 %v1715_v24, %s1613_s1  ;;  %v363_v46 = vmul.f32 %v356_v43, %v1699_v56 }
 0x5dc   :  { %v347_v35 = vpop.permute.xlu1 %346 }
 0x5e4   :  { %v361_v42 = vpop.permute.xlu1 %360 }
 0x5e5   :  { %v364_v44 = vmul.f32 %v361_v42, %v1697_v55 }
 0x640   :  { %v342_v34 = vpop.permute.xlu0 %341 }
 0x641   :  { %v349_v36 = vsel %vm182_vm8, %v265_v58, %v342_v34 }
 0x642   :  { %v350_v37 = vsel %vm98_vm3, %v349_v36, %v347_v35 }
 0x643   :  { %v372_v38 = vrot.slane %v350_v37, 4 }
 0x645   :  { %1401 = vmatpush.msk.msrb.mxu3 %vm378_vm15, %v372_v38 }
 0x646   :  { %1402 = vmatmul.msk.f32.vlgmr.msrb.gmra.mxu3 %vm373_vm4, %v368_v39 }
 0x648   :  { %v370_v40 = vpop.permute.xlu0 %369 }
 0x64e   :  { %1403 = vmatmul.msk.f32.gmra.mxu3 %vm373_vm4, %v370_v40 }
 0x6c9   :  { %v398_v41 = vpop.f32.mrf.mxu3 }
 0x6ca   :  { %v1739_v48 = vadd.f32 %v398_v41, %v363_v46  ;;  %v1788_v46 = vld [vmem:[#allocation2 + $0x18] sm:$0xff] }
 0x6d1   :  { %v401_v45 = vpop.f32.mrf.mxu3 }
 0x6d2   :  { %v1737_v47 = vadd.f32 %v401_v45, %v364_v44  ;;  %v1786_v45 = vld [vmem:[#allocation2 + $0x20] sm:$0xff] }
 0x6d3   :  { %617 = vmatpush.msra.mxu0 %v1786_v45 }
 0x6d4   :  { %1404 = vmatpush.msk.msrb.mxu2 %vm70_vm0, %v1737_v47 }
 0x6d5   :  { %618 = vmatpush.msra.mxu0 %v1788_v46 }
 0x6d6   :  { %430 = vmatpush.msrb.mxu2 %v1739_v48 }
 0x6d7   :  { %1405 = vmatmul.msk.f32.vlgmr.msrb.gmra.mxu2 %vm63_vm2, %v1743_v49 }
 0x75a   :  { %v432_v50 = vpop.f32.mrf.mxu2 }
 0x75b   :  { %478 = vrot.lane.b32.xlu1 %v432_v50, %s1613_s1  ;;  %1407 = vmatmul.msk.f32.vlgmr.msrb.gmra.mxu0 %vm98_vm3, %v432_v50 }
 0x7cd   :  { %v479_v8 = vpop.permute.xlu1 %478 }
 0x7d8   :  { %v455_v51 = vpop.f32.mrf.mxu0 }
 0x7d9   :  { %v456_v52 = vadd.f32 %v1677_v6, %v455_v51  ;;  %v1801_v51 = vld [vmem:[#allocation2 + $0x48] sm:$0xff] }
 0x7db   :  { %1507 = vtanh.f32 %v456_v52  ;;  %v1408_v54 = vmul.f32 -1.442695, %v456_v52  ;;  %v1805_v52 = vld [vmem:[#allocation2 + $0x40] sm:$0xff] }
 0x7dd   :  { %1509 = vpow2.f32 %v1408_v54 }
 0x7e1   :  { %v1508_v53 = vpop.eup %1507 }
 0x7e2   :  { %483 = vrot.lane.b32.xlu0 %v1508_v53, %s1612_s0  ;;  %v35_v53 = vld [vmem:[#allocation2 + $0x28] sm:$0x1] }
 0x7e3   :  { %v1510_v55 = vpop.eup %1509 }
 0x7e4   :  { %v461_v56 = vadd.f32 1.0, %v1510_v55 }
 0x7e6   :  { %1511 = vrcp.f32 %v461_v56  ;;  %v473_v63 = vand.u32 2147483648, %v461_v56  ;;  %vm467_vm6 = vweird.f32 %v461_v56  ;;  %v471_v0 = vand.u32 2147483647, %v461_v56 }
 0x7e8   :  { %v474_v1 = vor.u32 1.1754944e-38, %v473_v63  ;;  %vm472_vm11 = vcmp.eq.f32.partialorder %v471_v0, 8.507059e+37  ;;  %v41_v0 = vld [vmem:[#allocation2 + $0x58] sm:$0x1] }
 0x7ec   :  { %v1512_v58 = vpop.eup %1511 }
 0x7ed   :  { %v463_v59 = vmul.f32 %v1512_v58, %v461_v56  ;;  %vm468_vm5 = vweird.f32 %v1512_v58 }
 0x7ee   :  { %vm469_vm7 = vmor %vm467_vm6, %vm468_vm5  ;;  %vm633_vm5 = vcmask 302080  }
 0x7ef   :  { %v464_v60 = vsub.f32 1.0, %v463_v59  ;;  %v1810_v59 = vld [vmem:[#allocation2 + $0x38] sm:$0xff] }
 0x7f1   :  { %v465_v61 = vmul.f32 %v1512_v58, %v464_v60  ;;  %v1813_v60 = vld [vmem:[#allocation2 + $0x30] sm:$0xff] }
 0x7f3   :  { %v466_v62 = vadd.f32 %v1512_v58, %v465_v61 }
 0x7f5   :  { %v470_v6 = vsel %vm469_vm7, %v1512_v58, %v466_v62 }
 0x7f6   :  { %v475_v4 = vsel %vm472_vm11, %v474_v1, %v470_v6 }
 0x7f7   :  { %v481_v9 = vmul.f32 %v479_v8, %v475_v4 }
 0x854   :  { %v484_v3 = vpop.permute.xlu0 %483 }
 0x855   :  { %v486_v5 = vmul.f32 %v484_v3, %v475_v4 }
 0x857   :  { %488 = vrot.lane.b32.xlu2 %v486_v5, %s1611_s18 }
 0x8b1   :  { %v489_v10 = vpop.permute.xlu2 %488 }
 0x8b2   :  { %v491_v11 = vadd.f32 %v489_v10, %v481_v9 }
 0x8b4   :  { %1513 = vtanh.f32 %v491_v11  ;;  %v503_v12 = vrot.slane %v491_v11, 1 }
 0x8b6   :  { %v505_v13 = vadd.f32 %v503_v12, %v491_v11 }
 0x8b8   :  { %v512_v14 = vrot.slane %v505_v13, 6 }
 0x8ba   :  { %v1514_v15 = vpop.eup %1513  ;;  %513 = vrot.lane.b32.xlu2 %v512_v14, %s1616_s25 }
 0x8bb   :  { %494 = vrot.lane.b32.xlu0 %v1514_v15, %s1611_s18 }
 0x8c2   :  { %527 = vperm.xlu2 %1482, %v519_v17  }
 0x8c3   :  { %534 = vrot.lane.b32.xlu0 %v1760_v18, %s1620_s26 }
 0x8cb   :  { %522 = vperm.xlu0 %1483, %v518_v19  }
 0x914   :  { %v514_v31 = vpop.permute.xlu2 %513 }
 0x91c   :  { %v528_v38 = vpop.permute.xlu2 %527 }
 0x91d   :  { %v531_v40 = vmul.f32 %v528_v38, %v1737_v47  ;;  %v1835_v38 = vld [vmem:[#allocation2 + $0x60] sm:$0xff] }
 0x92d   :  { %v495_v20 = vpop.permute.xlu0 %494 }
 0x92e   :  { %v497_v21 = vmul.f32 %v495_v20, %v475_v4 }
 0x930   :  { %v499_v22 = vrot.slane %v497_v21, 1 }
 0x932   :  { %v501_v23 = vadd.f32 %v499_v22, %v497_v21 }
 0x934   :  { %v507_v29 = vrot.slane %v501_v23, 6 }
 0x935   :  { %v535_v35 = vpop.permute.xlu0 %534 }
 0x936   :  { %508 = vrot.lane.b32.xlu1 %v507_v29, %s1615_s24  ;;  %s1373_s24 = sshll.u32 %s1631_s23, 4  ;;  %s1374_s24 = int_to_ptr.vmem [resolvable:$true] %s1373_s24 }
 0x93d   :  { %v523_v39 = vpop.permute.xlu0 %522 }
 0x93e   :  { %536 = vrot.lane.b32.xlu1 %v1757_v16, %s1620_s26  ;;  %v530_v42 = vmul.f32 %v523_v39, %v1739_v48 }
 0x9a8   :  { %v509_v30 = vpop.permute.xlu1 %508 }
 0x9a9   :  { %v516_v32 = vsel %vm182_vm8, %v432_v50, %v509_v30  ;;  %v1624_v30 = vmov 2  }
 0x9aa   :  { %v517_v33 = vsel %vm98_vm3, %v516_v32, %v514_v31  ;;  %vm2024_vm3 = vcmask 130048   ;;  %1485 = vset.pattern.permute.xlu2 %v1624_v30  ;;  %1484 = vset.pattern.permute.xlu1 %v1624_v30 }
 0x9ab   :  { %v539_v34 = vrot.slane %v517_v33, 2 }
 0x9ad   :  { %1409 = vmatpush.msk.msra.mxu1 %vm545_vm12, %v539_v34 }
 0x9ae   :  { %1410 = vmatmul.msk.f32.vlgmr.msra.gmra.mxu1 %vm2022_vm13, %v535_v35 }
 0x9b0   :  { %v537_v36 = vpop.permute.xlu1 %536 }
 0x9b6   :  { %1411 = vmatmul.msk.f32.gmra.mxu1 %vm2022_vm13, %v537_v36 }
 0xa2b   :  { %v565_v37 = vpop.f32.mrf.mxu1 }
 0xa2c   :  { %v1779_v44 = vadd.f32 %v565_v37, %v530_v42  ;;  %v1833_v37 = vld [vmem:[#allocation2 + $0x68] sm:$0xff] }
 0xa33   :  { %v568_v41 = vpop.f32.mrf.mxu1 }
 0xa34   :  { %v1777_v43 = vadd.f32 %v568_v41, %v531_v40 }
 0xa36   :  { %1412 = vmatpush.msk.msra.mxu2 %vm70_vm0, %v1777_v43 }
 0xa38   :  { %591 = vmatpush.msra.mxu2 %v1779_v44 }
 0xa39   :  { %1413 = vmatmul.msk.f32.vlgmr.msra.gmra.mxu2 %vm63_vm2, %v1743_v49  ;;  %v1799_v49 = vld [vmem:[#allocation2 + $0x50] sm:$0x1f] }
 0xa3a   :  { %1415 = vmatpush.msk.msra.mxu3 %vm102_vm1, %v1799_v49  ;;  %715 = vmatpush.msrb.mxu2 %v1833_v37 }
 0xa3c   :  { %651 = vmatpush.msra.mxu3 %v1801_v51  ;;  %716 = vmatpush.msrb.mxu2 %v1835_v38 }
 0xa3e   :  { %652 = vmatpush.msra.mxu3 %v1805_v52  ;;  %1426 = vmatpush.msk.msra.mxu2 %vm102_vm1, %v1799_v49 }
 0xa40   :  { %653 = vmatpush.msra.mxu3 %v1810_v59  ;;  %935 = vmatpush.msra.mxu2 %v1801_v51 }
 0xa42   :  { %654 = vmatpush.msra.mxu3 %v1813_v60  ;;  %936 = vmatpush.msra.mxu2 %v1805_v52 }
 0xa44   :  { %905 = vmatpush.msrb.mxu3 %v1786_v45  ;;  %937 = vmatpush.msra.mxu2 %v1810_v59 }
 0xa46   :  { %906 = vmatpush.msrb.mxu3 %v1788_v46  ;;  %938 = vmatpush.msra.mxu2 %v1813_v60 }
 0xabc   :  { %v1792_v47 = vpop.f32.mrf.mxu2 }
 0xabd   :  { %v597_v48 = vrot.slane %v1792_v47, 2  ;;  %v801_v34 = vrot.slane %v1792_v47, 1 }
 0xabf   :  { %598 = vrot.lane.b32.xlu1 %v597_v48, %s1613_s1  ;;  %v803_v36 = vsel %vm545_vm12, %v597_v48, %v801_v34 }
 0xb31   :  { %v599_v50 = vpop.permute.xlu1 %598 }
 0xb32   :  { %1414 = vmatmul.msk.f32.vlgmr.msra.gmra.mxu0 %vm2024_vm3, %v599_v50 }
 0xbaf   :  { %v620_v54 = vpop.f32.mrf.mxu0 }
 0xbb0   :  { %v621_v55 = vadd.f32 %v620_v54, %v35_v53 }
 0xbb2   :  { %v623_v56 = vmax.f32 %v621_v55, 0.0  ;;  %v810_v55 = vmul.f32 %v803_v36, %v1792_v47 }
 0xbb4   :  { %v625_v58 = vrot.slane %v623_v56, 6 }
 0xbb6   :  { %626 = vrot.lane.b32.xlu2 %v625_v58, %s1621_s27 }
 0xc10   :  { %v627_v61 = vpop.permute.xlu2 %626 }
 0xc11   :  { %v630_v62 = vsel %vm629_vm14, %v1792_v47, %v627_v61 }
 0xc12   :  { %v632_v63 = vrot.slane %v630_v62, 2 }
 0xc14   :  { %1416 = vmatmul.msk.f32.vlgmr.msra.gmra.mxu3 %vm633_vm5, %v632_v63 }
 0xc97   :  { %v656_v6 = vpop.f32.mrf.mxu3 }
 0xc98   :  { %v657_v1 = vadd.f32 %v656_v6, %v41_v0 }
 0xc9a   :  { %1515 = vtanh.f32 %v657_v1  ;;  %v1417_v4 = vmul.f32 -1.442695, %v657_v1 }
 0xc9c   :  { %1517 = vpow2.f32 %v1417_v4 }
 0xca0   :  { %v1516_v3 = vpop.eup %1515 }
 0xca1   :  { %681 = vrot.lane.b32.xlu1 %v1516_v3, %s1622_s28 }
 0xca2   :  { %v1518_v5 = vpop.eup %1517 }
 0xca3   :  { %v662_v8 = vadd.f32 1.0, %v1518_v5 }
 0xca5   :  { %1519 = vrcp.f32 %v662_v8  ;;  %v674_v14 = vand.u32 2147483648, %v662_v8  ;;  %vm668_vm7 = vweird.f32 %v662_v8  ;;  %v672_v15 = vand.u32 2147483647, %v662_v8 }
 0xca7   :  { %v675_v21 = vor.u32 1.1754944e-38, %v674_v14  ;;  %vm673_vm13 = vcmp.eq.f32.partialorder %v672_v15, 8.507059e+37 }
 0xcab   :  { %v1520_v9 = vpop.eup %1519 }
 0xcac   :  { %v664_v10 = vmul.f32 %v1520_v9, %v662_v8  ;;  %vm669_vm6 = vweird.f32 %v1520_v9 }
 0xcad   :  { %vm670_vm11 = vmor %vm668_vm7, %vm669_vm6 }
 0xcae   :  { %v665_v11 = vsub.f32 1.0, %v664_v10 }
 0xcb0   :  { %v666_v12 = vmul.f32 %v1520_v9, %v665_v11 }
 0xcb2   :  { %v667_v13 = vadd.f32 %v1520_v9, %v666_v12  ;;  %v1901_v12 = vld [vmem:[#allocation2 + $0x58] ss:$0 sm:$0xff] }
 0xcb4   :  { %v671_v20 = vsel %vm670_vm11, %v1520_v9, %v667_v13 }
 0xcb5   :  { %v676_v23 = vsel %vm673_vm13, %v675_v21, %v671_v20  ;;  %vm787_vm13 = vcmask 64512  }
 0xcb6   :  { %v679_v31 = vmul.f32 %v676_v23, %v623_v56  ;;  %v811_v56 = vadd.f32 %v803_v36, %v1792_v47 }
 0xd13   :  { %v682_v22 = vpop.permute.xlu1 %681 }
 0xd14   :  { %v684_v29 = vmul.f32 %v682_v22, %v676_v23 }
 0xd16   :  { %686 = vrot.lane.b32.xlu2 %v684_v29, %s1623_s29 }
 0xd70   :  { %v687_v32 = vpop.permute.xlu2 %686 }
 0xd71   :  { %v689_v33 = vadd.f32 %v687_v32, %v679_v31 }
 0xd73   :  { %1521 = vtanh.f32 %v689_v33  ;;  %792 = vrot.lane.b32.xlu2 %v689_v33, %s1625_s30 }
 0xd79   :  { %v1522_v35 = vpop.eup %1521 }
 0xd7a   :  { %692 = vrot.lane.b32.xlu0 %v1522_v35, %s1623_s29 }
 0xd7b   :  { %805 = vrot.lane.b32.xlu2 %v803_v36, %s1626_s4 }
 0xd83   :  { %820 = vperm.xlu2 %1485, %v518_v19  }
 0xd8b   :  { %1486 = vset.pattern.permute.xlu2 %v1619_v7 }
 0xdcd   :  { %v793_v41 = vpop.permute.xlu2 %792 }
 0xdec   :  { %v693_v7 = vpop.permute.xlu0 %692 }
 0xded   :  { %v695_v19 = vmul.f32 %v693_v7, %v676_v23 }
 0xdef   :  { %697 = vrot.lane.b32.xlu0 %v695_v19, %s1627_s5  ;;  %789 = vrot.lane.b32.xlu1 %v695_v19, %s1628_s6 }
 0xdf7   :  { %784 = vrot.lane.b32.xlu1 %v689_v33, %s1629_s7 }
 0xdff   :  { %824 = vperm.xlu1 %1484, %v519_v17  }
 0xe61   :  { %v698_v39 = vpop.permute.xlu0 %697  ;;  %v790_v40 = vpop.permute.xlu1 %789 }
 0xe62   :  { %1418 = vmatmul.msk.f32.vlgmr.msrb.gmra.mxu2 %vm2024_vm3, %v698_v39  ;;  %v795_v42 = vsel %vm787_vm13, %v790_v40, %v793_v41 }
 0xe63   :  { %1438 = vmatpush.msk.msrb.mxu2 %vm102_vm1, %v1799_v49  ;;  %v797_v48 = vrot.slane %v795_v42, 7  ;;  %v806_v49 = vpop.permute.xlu2 %805 }
 0xe64   :  { %v808_v54 = vmul.f32 %v806_v49, %v1792_v47 }
 0xe65   :  { %1221 = vmatpush.msrb.mxu2 %v1801_v51 }
 0xe66   :  { %v809_v51 = vadd.f32 %v808_v54, %v803_v36 }
 0xe67   :  { %1222 = vmatpush.msrb.mxu2 %v1805_v52 }
 0xe68   :  { %v812_v52 = vsel %vm373_vm4, %v809_v51, %v810_v55 }
 0xe69   :  { %v785_v50 = vpop.permute.xlu1 %784  ;;  %1223 = vmatpush.msrb.mxu2 %v1810_v59  ;;  %v813_v59 = vsel %vm205_vm10, %v812_v52, %v811_v56 }
 0xe6a   :  { %v788_v17 = vsel %vm787_vm13, %v698_v39, %v785_v50 }
 0xe6b   :  { %v799_v53 = vsel %vm545_vm12, %v788_v17, %v797_v48  ;;  %1224 = vmatpush.msrb.mxu2 %v1813_v60  ;;  %v821_v63 = vpop.permute.xlu2 %820 }
 0xe6c   :  { %815 = vrot.lane.b32.xlu0 %v799_v53, %s1616_s25  ;;  %v827_v1 = vmul.f32 %v821_v63, %v1779_v44  ;;  %v1892_v44 = vld [vmem:[#allocation2 + $0x28] ss:$0 sm:$0xff] }
 0xe71   :  { %v825_v62 = vpop.permute.xlu1 %824 }
 0xe72   :  { %v828_v0 = vmul.f32 %v825_v62, %v1777_v43 }
 0xede   :  { %v816_v58 = vpop.permute.xlu0 %815 }
 0xedf   :  { %v818_v61 = vsel %vm182_vm8, %v813_v59, %v816_v58 }
 0xee0   :  { %1420 = vmatpush.msk.msrb.mxu0 %vm378_vm15, %v818_v61 }
 0xee1   :  { %1421 = vmatmul.msk.f32.vlgmr.msrb.gmra.mxu0 %vm373_vm4, %v1760_v18 }
 0xee5   :  { %v1899_v11 = vpop.f32.mrf.mxu2 }
 0xee9   :  { %1422 = vmatmul.msk.f32.gmra.mxu0 %vm373_vm4, %v1757_v16 }
 0xf5e   :  { %v853_v60 = vpop.f32.mrf.mxu0 }
 0xf5f   :  { %v1876_v4 = vadd.f32 %v853_v60, %v827_v1 }
 0xf66   :  { %v856_v6 = vpop.f32.mrf.mxu0 }
 0xf67   :  { %v1874_v3 = vadd.f32 %v856_v6, %v828_v0 }
 0xf69   :  { %1423 = vmatpush.msk.msrb.mxu1 %vm70_vm0, %v1874_v3 }
 0xf6b   :  { %879 = vmatpush.msrb.mxu1 %v1876_v4 }
 0xf6c   :  { %1424 = vmatmul.msk.f32.vlgmr.msrb.gmra.mxu1 %vm63_vm2, %v1703_v57 }
 0xf6d   :  { %1000 = vmatpush.msra.mxu1 %v1833_v37 }
 0xf6f   :  { %1001 = vmatpush.msra.mxu1 %v1835_v38 }
 0xf71   :  { %1194 = vmatpush.msrb.mxu1 %v1786_v45 }
 0xf73   :  { %1195 = vmatpush.msrb.mxu1 %v1788_v46 }
 0xfe9   :  { %v1887_v16 = vpop.f32.mrf.mxu1 }
 0xfea   :  { %v886_v18 = vrot.slane %v1887_v16, 4  ;;  %v1089_v48 = vrot.slane %v1887_v16, 2 }
 0xfec   :  { %887 = vrot.lane.b32.xlu0 %v886_v18, %s1613_s1  ;;  %v1091_v17 = vsel %vm378_vm15, %v886_v18, %v1089_v48 }
 0xfed   :  { %v1098_v62 = vmul.f32 %v1091_v17, %v1887_v16  ;;  %v1099_v0 = vadd.f32 %v1091_v17, %v1887_v16 }
0x105e   :  { %v888_v43 = vpop.permute.xlu0 %887 }
0x105f   :  { %1425 = vmatmul.msk.f32.vlgmr.msrb.gmra.mxu3 %vm2024_vm3, %v888_v43 }
0x10e2   :  { %v908_v57 = vpop.f32.mrf.mxu3 }
0x10e3   :  { %v909_v5 = vadd.f32 %v1892_v44, %v908_v57 }
0x10e5   :  { %v911_v8 = vmax.f32 %v909_v5, 0.0 }
0x10e7   :  { %v913_v9 = vrot.slane %v911_v8, 4 }
0x10e9   :  { %914 = vrot.lane.b32.xlu1 %v913_v9, %s1621_s27 }
0x115b   :  { %v915_v45 = vpop.permute.xlu1 %914 }
0x115c   :  { %v917_v46 = vsel %vm629_vm14, %v1887_v16, %v915_v45 }
0x115d   :  { %v920_v10 = vrot.slane %v917_v46, 4 }
0x115f   :  { %1427 = vmatmul.msk.f32.vlgmr.msra.gmra.mxu2 %vm633_vm5, %v920_v10 }
0x11e2   :  { %v940_v13 = vpop.f32.mrf.mxu2 }
0x11e3   :  { %v941_v14 = vadd.f32 %v1901_v12, %v940_v13 }
0x11e5   :  { %1523 = vtanh.f32 %v941_v14  ;;  %v1428_v20 = vmul.f32 -1.442695, %v941_v14 }
0x11e7   :  { %1525 = vpow2.f32 %v1428_v20 }
0x11eb   :  { %v1524_v15 = vpop.eup %1523 }
0x11ec   :  { %965 = vrot.lane.b32.xlu2 %v1524_v15, %s1622_s28 }
0x11ed   :  { %v1526_v21 = vpop.eup %1525 }
0x11ee   :  { %v946_v22 = vadd.f32 1.0, %v1526_v21 }
0x11f0   :  { %1527 = vrcp.f32 %v946_v22  ;;  %v958_v33 = vand.u32 2147483648, %v946_v22  ;;  %vm952_vm6 = vweird.f32 %v946_v22  ;;  %v956_v34 = vand.u32 2147483647, %v946_v22 }
0x11f2   :  { %v959_v36 = vor.u32 1.1754944e-38, %v958_v33  ;;  %vm957_vm11 = vcmp.eq.f32.partialorder %v956_v34, 8.507059e+37 }
0x11f6   :  { %v1528_v23 = vpop.eup %1527 }
0x11f7   :  { %v948_v29 = vmul.f32 %v1528_v23, %v946_v22  ;;  %vm953_vm1 = vweird.f32 %v1528_v23 }
0x11f8   :  { %vm954_vm7 = vmor %vm952_vm6, %vm953_vm1 }
0x11f9   :  { %v949_v30 = vsub.f32 1.0, %v948_v29 }
0x11fb   :  { %v950_v31 = vmul.f32 %v1528_v23, %v949_v30 }
0x11fd   :  { %v951_v32 = vadd.f32 %v1528_v23, %v950_v31 }
0x11ff   :  { %v955_v35 = vsel %vm954_vm7, %v1528_v23, %v951_v32 }
0x1200   :  { %v960_v19 = vsel %vm957_vm11, %v959_v36, %v955_v35  ;;  %v45_v36 = vlaneseq }
0x1201   :  { %v963_v40 = vmul.f32 %v960_v19, %v911_v8 }
0x1246   :  { %v966_v7 = vpop.permute.xlu2 %965 }
0x1247   :  { %v968_v39 = vmul.f32 %v966_v7, %v960_v19 }
0x1249   :  { %970 = vrot.lane.b32.xlu0 %v968_v39, %s1623_s29  ;;  %v46_v39 = vand.u32 127, %v45_v36 }
0x124b   :  { %vm55_vm1 = vcmp.eq.s32.totalorder %v46_v39, 10  ;;  %vm50_vm11 = vcmp.eq.s32.totalorder %v46_v39, 6 }
0x12bb   :  { %v971_v41 = vpop.permute.xlu0 %970 }
0x12bc   :  { %v973_v42 = vadd.f32 %v971_v41, %v963_v40 }
0x12be   :  { %1529 = vtanh.f32 %v973_v42  ;;  %1080 = vrot.lane.b32.xlu0 %v973_v42, %s1625_s30 }
0x12c4   :  { %v1530_v50 = vpop.eup %1529 }
0x12c5   :  { %976 = vrot.lane.b32.xlu1 %v1530_v50, %s1623_s29 }
0x12c6   :  { %1093 = vrot.lane.b32.xlu0 %v1091_v17, %s1626_s4 }
0x12ce   :  { %1108 = vperm.xlu0 %1483, %v351_v28  }
0x1330   :  { %v1081_v51 = vpop.permute.xlu0 %1080 }
0x1337   :  { %v977_v53 = vpop.permute.xlu1 %976 }
0x1338   :  { %v979_v49 = vmul.f32 %v977_v53, %v960_v19 }
0x133a   :  { %982 = vrot.lane.b32.xlu1 %v979_v49, %s1627_s5  ;;  %1077 = vrot.lane.b32.xlu2 %v979_v49, %s1628_s6 }
0x1342   :  { %1073 = vrot.lane.b32.xlu2 %v973_v42, %s1629_s7 }
0x134a   :  { %1112 = vperm.xlu2 %1486, %v352_v26   ;;  %v1094_v26 = vpop.permute.xlu0 %1093 }
0x134b   :  { %v1096_v61 = vmul.f32 %v1094_v26, %v1887_v16 }
0x134d   :  { %v1097_v60 = vadd.f32 %v1096_v61, %v1091_v17 }
0x134f   :  { %v1100_v63 = vsel %vm373_vm4, %v1097_v60, %v1098_v62  ;;  %vm48_vm4 = vcmp.eq.s32.totalorder %v46_v39, 1 }
0x1350   :  { %v1101_v1 = vsel %vm205_vm10, %v1100_v63, %v1099_v0 }
0x1352   :  { %v1109_v43 = vpop.permute.xlu0 %1108 }
0x1353   :  { %v1115_v8 = vmul.f32 %v1109_v43, %v1876_v4 }
0x1394   :  { %v1078_v54 = vpop.permute.xlu2 %1077 }
0x1395   :  { %v1083_v55 = vsel %vm787_vm13, %v1078_v54, %v1081_v51 }
0x1396   :  { %v1085_v52 = vrot.slane %v1083_v55, 6 }
0x139c   :  { %v1074_v56 = vpop.permute.xlu2 %1073 }
0x13ac   :  { %v983_v58 = vpop.permute.xlu1 %982 }
0x13ad   :  { %v1076_v28 = vsel %vm787_vm13, %v983_v58, %v1074_v56  ;;  %1429 = vmatmul.msk.f32.vlgmr.msra.gmra.mxu1 %vm2024_vm3, %v983_v58  ;;  %vm54_vm13 = vcmp.eq.s32.totalorder %v46_v39, 4 }
0x13ae   :  { %v1087_v59 = vsel %vm378_vm15, %v1076_v28, %v1085_v52  ;;  %1285 = vmatpush.msra.mxu1 %v1833_v37 }
0x13af   :  { %1103 = vrot.lane.b32.xlu1 %v1087_v59, %s1616_s25 }
0x13b0   :  { %1286 = vmatpush.msra.mxu1 %v1835_v38  ;;  %v1113_v38 = vpop.permute.xlu2 %1112 }
0x13b1   :  { %v1116_v57 = vmul.f32 %v1113_v38, %v1874_v3 }
0x1421   :  { %v1104_v6 = vpop.permute.xlu1 %1103 }
0x1422   :  { %v1106_v18 = vsel %vm182_vm8, %v1101_v1, %v1104_v6  ;;  %vm47_vm8 = vcmp.eq.s32.totalorder %v46_v39, 0  ;;  %v1981_v6 = vld [vmem:[#allocation2 + $0x70] ss:$0 sm:$0xff] }
0x1423   :  { %1431 = vmatpush.msk.msra.mxu3 %vm2023_vm9, %v1106_v18  ;;  %vm49_vm7 = vmor %vm47_vm8, %vm48_vm4 }
0x1424   :  { %1432 = vmatmul.msk.f32.vlgmr.msra.gmra.mxu3 %vm205_vm10, %v1718_v27  ;;  %vm1967_vm9 = vmor %vm54_vm13, %vm55_vm1  ;;  %vm751_vm13 = vcmask 32768   ;;  %vm1040_vm1 = vcmask 33792  }
0x142a   :  { %v1947_v4 = vpop.f32.mrf.mxu1 }
0x142b   :  { %v1004_v1 = vadd.f32 %v1981_v6, %v1947_v4 }
0x142c   :  { %1433 = vmatmul.msk.f32.gmra.mxu3 %vm205_vm10, %v1715_v24 }
0x142d   :  { %v1430_v18 = vmul.f32 -1.442695, %v1004_v1 }
0x14a7   :  { %v1141_v37 = vpop.f32.mrf.mxu3 }
0x14a8   :  { %v1147_v45 = vadd.f32 %v1141_v37, %v1115_v8 }
0x14af   :  { %v1144_v5 = vpop.f32.mrf.mxu3 }
0x14b0   :  { %v1148_v9 = vadd.f32 %v1144_v5, %v1116_v57 }
0x14b2   :  { %1434 = vmatpush.msk.msra.mxu0 %vm70_vm0, %v1148_v9 }
0x14b4   :  { %1167 = vmatpush.msra.mxu0 %v1147_v45 }
0x14b5   :  { %1435 = vmatmul.msk.f32.vlgmr.msra.gmra.mxu0 %vm63_vm2, %v1668_v2 }
0x14bd   :  { %1436 = vmatmul.msk.f32.gmra.mxu0 %vm63_vm2, %v1683_v25 }
0x1532   :  { %v1943_v24 = vpop.f32.mrf.mxu0 }
0x153a   :  { %v1172_v27 = vpop.f32.mrf.mxu0 }
0x153b   :  { %1176 = vrot.lane.b32.xlu1 %v1172_v27, %s1613_s1 }
0x15ad   :  { %v1177_v3 = vpop.permute.xlu1 %1176 }
0x15ae   :  { %1437 = vmatmul.msk.f32.vlgmr.msrb.gmra.mxu1 %vm2024_vm3, %v1177_v3  ;;  %vm51_vm3 = vmor %vm49_vm7, %vm50_vm11 }
0x162b   :  { %v1197_v46 = vpop.f32.mrf.mxu1 }
0x162c   :  { %v1950_v10 = vadd.f32 %v1892_v44, %v1197_v46  ;;  %v44_v44 = vld [vmem:[#allocation2 + $0x70] sm:$0x1] }
0x162d   :  { %v719_v21 = vadd.f32 %v1899_v11, %v44_v44 }
0x162e   :  { %v1200_v13 = vmax.f32 %v1950_v10, 0.0 }
0x162f   :  { %v1419_v22 = vmul.f32 -1.442695, %v719_v21 }
0x1630   :  { %1202 = vrot.lane.b32.xlu2 %v1200_v13, %s1621_s27 }
0x168a   :  { %v1203_v2 = vpop.permute.xlu2 %1202 }
0x168b   :  { %v1205_v25 = vsel %vm629_vm14, %v1172_v27, %v1203_v2 }
0x168c   :  { %1439 = vmatmul.msk.f32.vlgmr.msrb.gmra.mxu2 %vm633_vm5, %v1205_v25 }
0x170f   :  { %v1226_v14 = vpop.f32.mrf.mxu2 }
0x1710   :  { %v1227_v15 = vadd.f32 %v1901_v12, %v1226_v14 }
0x1712   :  { %1531 = vtanh.f32 %v1227_v15  ;;  %v1440_v23 = vmul.f32 -1.442695, %v1227_v15 }
0x1713   :  { %1533 = vpow2.f32 %v1419_v22 }
0x1714   :  { %1535 = vpow2.f32 %v1440_v23 }
0x1718   :  { %v1532_v20 = vpop.eup %1531 }
0x1719   :  { %1251 = vrot.lane.b32.xlu0 %v1532_v20, %s1622_s28  ;;  %v1534_v29 = vpop.eup %1533  ;;  %s1375_s28 = sshll.u32 %s2021_s3, 4  ;;  %s1376_s28 = int_to_ptr.hbm [resolvable:$true] %s1375_s28 }
0x171a   :  { %v1536_v30 = vpop.eup %1535  ;;  %v725_v31 = vadd.f32 1.0, %v1534_v29 }
0x171b   :  { %v1232_v32 = vadd.f32 1.0, %v1536_v30 }
0x171c   :  { %1537 = vrcp.f32 %v725_v31  ;;  %vm731_vm10 = vweird.f32 %v725_v31  ;;  %v737_v48 = vand.u32 2147483648, %v725_v31  ;;  %v735_v53 = vand.u32 2147483647, %v725_v31 }
0x171d   :  { %1539 = vrcp.f32 %v1232_v32  ;;  %v1244_v50 = vand.u32 2147483648, %v1232_v32  ;;  %vm1238_vm5 = vweird.f32 %v1232_v32  ;;  %v1242_v49 = vand.u32 2147483647, %v1232_v32 }
0x171e   :  { %v738_v55 = vor.u32 1.1754944e-38, %v737_v48  ;;  %1541 = vtanh.f32 %v719_v21 }
0x171f   :  { %v1245_v52 = vor.u32 1.1754944e-38, %v1244_v50  ;;  %1543 = vpow2.f32 %v1430_v18 }
0x1722   :  { %v1538_v33 = vpop.eup %1537 }
0x1723   :  { %v1540_v34 = vpop.eup %1539  ;;  %v727_v12 = vmul.f32 %v1538_v33, %v725_v31  ;;  %vm732_vm0 = vweird.f32 %v1538_v33 }
0x1724   :  { %v1234_v35 = vmul.f32 %v1540_v34, %v1232_v32  ;;  %vm1239_vm2 = vweird.f32 %v1540_v34  ;;  %vm1961_vm14 = vmor %vm731_vm10, %vm732_vm0  ;;  %vm736_vm0 = vcmp.eq.f32.partialorder %v735_v53, 8.507059e+37  ;;  %vm1243_vm10 = vcmp.eq.f32.partialorder %v1242_v49, 8.507059e+37  ;;  %v1542_v62 = vpop.eup %1541 }
0x1725   :  { %v728_v7 = vsub.f32 1.0, %v727_v12  ;;  %vm1240_vm6 = vmor %vm1238_vm5, %vm1239_vm2  ;;  %vm52_vm2 = vcmp.eq.s32.totalorder %v46_v39, 7  ;;  %v1544_v37 = vpop.eup %1543 }
0x1726   :  { %v1235_v19 = vsub.f32 1.0, %v1234_v35  ;;  %vm1974_vm8 = vmor %vm51_vm3, %vm52_vm2  ;;  %v1010_v38 = vadd.f32 1.0, %v1544_v37  ;;  %vm2032_vm2 = vcmask 1043456  }
0x1727   :  { %v729_v40 = vmul.f32 %v1538_v33, %v728_v7 }
0x1728   :  { %v1236_v11 = vmul.f32 %v1540_v34, %v1235_v19  ;;  %1545 = vrcp.f32 %v1010_v38  ;;  %v1022_v3 = vand.u32 2147483648, %v1010_v38  ;;  %vm1016_vm4 = vweird.f32 %v1010_v38 }
0x1729   :  { %v730_v41 = vadd.f32 %v1538_v33, %v729_v40  ;;  %v1020_v2 = vand.u32 2147483647, %v1010_v38 }
0x172a   :  { %v1237_v42 = vadd.f32 %v1540_v34, %v1236_v11  ;;  %v1023_v25 = vor.u32 1.1754944e-38, %v1022_v3 }
0x172b   :  { %v734_v54 = vsel %vm1961_vm14, %v1538_v33, %v730_v41  ;;  %vm1021_vm5 = vcmp.eq.f32.partialorder %v1020_v2, 8.507059e+37 }
0x172c   :  { %v1241_v51 = vsel %vm1240_vm6, %v1540_v34, %v1237_v42  ;;  %v739_v58 = vsel %vm736_vm0, %v738_v55, %v734_v54  ;;  %vm2031_vm6 = vcmask 130048  }
0x172d   :  { %v1246_v59 = vsel %vm1243_vm10, %v1245_v52, %v1241_v51  ;;  %v741_v61 = vsel %vm1967_vm9, %v719_v21, %v739_v58 }
0x172e   :  { %v742_v63 = vsel %vm1974_vm8, %v1542_v62, %v741_v61  ;;  %v1546_v43 = vpop.eup %1545  ;;  %v1249_v9 = vmul.f32 %v1246_v59, %v1200_v13 }
0x172f   :  { %v744_v0 = vrot.slane %v742_v63, 7  ;;  %v1012_v57 = vmul.f32 %v1546_v43, %v1010_v38  ;;  %vm1017_vm3 = vweird.f32 %v1546_v43 }
0x1730   :  { %vm1018_vm14 = vmor %vm1016_vm4, %vm1017_vm3  ;;  %vm1321_vm3 = vcmask 35840  }
0x1731   :  { %v1013_v5 = vsub.f32 1.0, %v1012_v57 }
0x1733   :  { %v1014_v8 = vmul.f32 %v1546_v43, %v1013_v5 }
0x1735   :  { %v1015_v45 = vadd.f32 %v1546_v43, %v1014_v8 }
0x1737   :  { %v1019_v4 = vsel %vm1018_vm14, %v1546_v43, %v1015_v45  ;;  %vm1360_vm14 = vcmask 10240  }
0x1738   :  { %v1024_v14 = vsel %vm1021_vm5, %v1023_v25, %v1019_v4  ;;  %vm1364_vm5 = vcmask 0  }
0x1739   :  { %v1028_v10 = vsel %vm1967_vm9, %v1004_v1, %v1024_v14 }
0x178b   :  { %v1252_v28 = vpop.permute.xlu0 %1251 }
0x178c   :  { %v1254_v26 = vmul.f32 %v1252_v28, %v1246_v59 }
0x178e   :  { %1256 = vrot.lane.b32.xlu1 %v1254_v26, %s1623_s29 }
0x1796   :  { %745 = vrot.lane.b32.xlu1 %v744_v0, %s1630_s8 }
0x1800   :  { %v1257_v27 = vpop.permute.xlu1 %1256 }
0x1801   :  { %v1259_v46 = vadd.f32 %v1257_v27, %v1249_v9 }
0x1803   :  { %1547 = vtanh.f32 %v1259_v46 }
0x1804   :  { %1549 = vtanh.f32 %v1004_v1 }
0x1808   :  { %v746_v15 = vpop.permute.xlu1 %745 }
0x1809   :  { %v1548_v20 = vpop.eup %1547  ;;  %v748_v44 = vsel %vm545_vm12, %v742_v63, %v746_v15 }
0x180a   :  { %v749_v13 = vsub.f32 %v748_v44, %v1792_v47  ;;  %1262 = vrot.lane.b32.xlu2 %v1548_v20, %s1623_s29  ;;  %v1550_v21 = vpop.eup %1549 }
0x180b   :  { %v1031_v23 = vsel %vm1974_vm8, %v1550_v21, %v1028_v10 }
0x180c   :  { %v750_v22 = vand.u32 2147483647, %v749_v13  ;;  %v1033_v30 = vrot.slane %v1031_v23, 6 }
0x180e   :  { %v752_v29 = vsel %vm751_vm13, %v750_v22, 0.0  ;;  %v764_v31 = vrot.slane %v750_v22, 1 }
0x180f   :  { %753 = vadd.xlane.f32.xlu1 %v752_v29 }
0x1810   :  { %v766_v32 = vsel %vm751_vm13, %v764_v31, 0.0 }
0x1812   :  { %1034 = vrot.lane.b32.xlu2 %v1033_v30, %s1630_s8 }
0x183b   :  { %767 = vadd.xlane.f32.xlu2 %v766_v32 }
0x1864   :  { %v1263_v33 = vpop.permute.xlu2 %1262 }
0x1865   :  { %v1265_v34 = vmul.f32 %v1263_v33, %v1246_v59 }
0x1867   :  { %1267 = vrot.lane.b32.xlu0 %v1265_v34, %s1627_s5 }
0x186c   :  { %v1035_v47 = vpop.permute.xlu2 %1034 }
0x186d   :  { %v1037_v12 = vsel %vm378_vm15, %v1031_v23, %v1035_v47 }
0x186e   :  { %v1038_v35 = vsub.f32 %v1037_v12, %v1887_v16 }
0x1870   :  { %v1039_v36 = vand.u32 2147483647, %v1038_v35 }
0x1872   :  { %v1053_v7 = vrot.slane %v1039_v36, 2  ;;  %v1041_v19 = vsel %vm1040_vm1, %v1039_v36, 0.0 }
0x1874   :  { %v1055_v39 = vsel %vm1040_vm1, %v1053_v7, 0.0 }
0x1875   :  { %1056 = vadd.xlane.f32.xlu2 %v1055_v39 }
0x1882   :  { %v754_v40 = vpop.xlane.xlu1 %753 }
0x1883   :  { %v755_v11 = vrot.slane %v754_v40, 4 }
0x1885   :  { %v756_v41 = vadd.f32 %v755_v11, %v754_v40 }
0x1887   :  { %v757_v42 = vrot.slane %v756_v41, 2 }
0x1889   :  { %v758_v48 = vadd.f32 %v757_v42, %v756_v41 }
0x188b   :  { %v759_v50 = vrot.slane %v758_v48, 1 }
0x188d   :  { %v760_v17 = vadd.f32 %v759_v50, %v758_v48 }
0x188f   :  { %1443 = vpush %v760_v17 }
0x18ae   :  { %v768_v53 = vpop.xlane.xlu2 %767 }
0x18af   :  { %v769_v49 = vrot.slane %v768_v53, 4 }
0x18b1   :  { %v770_v54 = vadd.f32 %v769_v49, %v768_v53 }
0x18b3   :  { %v771_v51 = vrot.slane %v770_v54, 2 }
0x18b5   :  { %v772_v55 = vadd.f32 %v771_v51, %v770_v54 }
0x18b7   :  { %v773_v16 = vrot.slane %v772_v55, 1 }
0x18b9   :  { %v774_v52 = vadd.f32 %v773_v16, %v772_v55 }
0x18bb   :  { %1445 = vpush %v774_v52 }
0x18c0   :  { %s1444_s9 = spop %1443 }
0x18c1   :  { %s762_s16 = smul.f32 0.2, %s1444_s9 }
0x18c3   :  { %v777_v16 = vstv %s762_s16 }
0x18d9   :  { %v1268_v58 = vpop.permute.xlu0 %1267 }
0x18da   :  { %1441 = vmatmul.msk.f32.vlgmr.msra.gmra.mxu1 %vm2031_vm6, %v1268_v58 }
0x18e8   :  { %v1057_v56 = vpop.xlane.xlu2 %1056 }
0x18e9   :  { %v1058_v20 = vrot.slane %v1057_v56, 4 }
0x18eb   :  { %v1059_v60 = vadd.f32 %v1058_v20, %v1057_v56 }
0x18ec   :  { %s1446_s10 = spop %1445 }
0x18ed   :  { %v1060_v44 = vrot.slane %v1059_v60, 2  ;;  %s776_s15 = smul.f32 0.2, %s1446_s10 }
0x18ef   :  { %v1061_v22 = vadd.f32 %v1060_v44, %v1059_v60  ;;  %s780_s20 = sadd.f32 %s776_s15, %s762_s16  ;;  %v778_v49 = vstv %s776_s15 }
0x18f1   :  { %v1062_v30 = vrot.slane %v1061_v22, 1 }
0x18f3   :  { %v1063_v32 = vadd.f32 %v1062_v30, %v1061_v22 }
0x1957   :  { %v1288_v28 = vpop.f32.mrf.mxu1 }
0x1958   :  { %v1289_v59 = vadd.f32 %v1981_v6, %v1288_v28 }
0x195a   :  { %v1442_v26 = vmul.f32 -1.442695, %v1289_v59 }
0x195c   :  { %1551 = vpow2.f32 %v1442_v26 }
0x1962   :  { %v1552_v61 = vpop.eup %1551 }
0x1963   :  { %v1295_v62 = vadd.f32 1.0, %v1552_v61 }
0x1965   :  { %1553 = vrcp.f32 %v1295_v62  ;;  %v1307_v18 = vand.u32 2147483648, %v1295_v62  ;;  %v1305_v38 = vand.u32 2147483647, %v1295_v62  ;;  %vm1301_vm11 = vweird.f32 %v1295_v62 }
0x1966   :  { %1555 = vtanh.f32 %v1289_v59 }
0x1967   :  { %v1308_v57 = vor.u32 1.1754944e-38, %v1307_v18  ;;  %vm1306_vm10 = vcmp.eq.f32.partialorder %v1305_v38, 8.507059e+37 }
0x196b   :  { %v1554_v63 = vpop.eup %1553 }
0x196c   :  { %v1297_v0 = vmul.f32 %v1554_v63, %v1295_v62  ;;  %vm1302_vm7 = vweird.f32 %v1554_v63  ;;  %v1556_v8 = vpop.eup %1555 }
0x196d   :  { %vm1303_vm0 = vmor %vm1301_vm11, %vm1302_vm7 }
0x196e   :  { %v1298_v1 = vsub.f32 1.0, %v1297_v0 }
0x1970   :  { %v1299_v37 = vmul.f32 %v1554_v63, %v1298_v1 }
0x1972   :  { %v1300_v43 = vadd.f32 %v1554_v63, %v1299_v37 }
0x1974   :  { %v1304_v5 = vsel %vm1303_vm0, %v1554_v63, %v1300_v43 }
0x1975   :  { %v1309_v6 = vsel %vm1306_vm10, %v1308_v57, %v1304_v5 }
0x1976   :  { %v1311_v9 = vsel %vm1967_vm9, %v1289_v59, %v1309_v6  ;;  %vm2033_vm9 = vcmask 7168  }
0x1977   :  { %v1312_v45 = vsel %vm1974_vm8, %v1556_v8, %v1311_v9  ;;  %vm2034_vm8 = vmmov %vm2033_vm9 }
0x1978   :  { %v1314_v27 = vrot.slane %v1312_v45, 4  ;;  %vm2035_vm4 = vmmov %vm2034_vm8 }
0x1979   :  { %v779_v58 = vsel %vm2035_vm4, %v777_v16, %v778_v49 }
0x197a   :  { %1315 = vrot.lane.b32.xlu0 %v1314_v27, %s1630_s8 }
0x19a4   :  { %1042 = vadd.xlane.f32.xlu0 %v1041_v19 }
0x19ec   :  { %v1316_v3 = vpop.permute.xlu0 %1315 }
0x19ed   :  { %v1318_v46 = vsel %vm2032_vm2, %v1312_v45, %v1316_v3 }
0x19ee   :  { %v1319_v2 = vsub.f32 %v1318_v46, %v1943_v24 }
0x19f0   :  { %v1320_v4 = vand.u32 2147483647, %v1319_v2 }
0x19f2   :  { %v1322_v25 = vsel %vm1321_vm3, %v1320_v4, 0.0  ;;  %v1334_v14 = vrot.slane %v1320_v4, 4 }
0x19f3   :  { %1323 = vadd.xlane.f32.xlu1 %v1322_v25 }
0x19f4   :  { %v1336_v15 = vsel %vm1321_vm3, %v1334_v14, 0.0 }
0x19f5   :  { %1337 = vadd.xlane.f32.xlu2 %v1336_v15 }
0x1a17   :  { %v1043_v10 = vpop.xlane.xlu0 %1042 }
0x1a18   :  { %v1044_v13 = vrot.slane %v1043_v10, 4 }
0x1a1a   :  { %v1045_v21 = vadd.f32 %v1044_v13, %v1043_v10 }
0x1a1c   :  { %v1046_v23 = vrot.slane %v1045_v21, 2 }
0x1a1e   :  { %v1047_v29 = vadd.f32 %v1046_v23, %v1045_v21 }
0x1a20   :  { %v1048_v31 = vrot.slane %v1047_v29, 1 }
0x1a22   :  { %v1049_v24 = vadd.f32 %v1048_v31, %v1047_v29 }
0x1a24   :  { %1447 = vpush %v1049_v24 }
0x1a25   :  { %1449 = vpush %v1063_v32 }
0x1a55   :  { %s1448_s11 = spop %1447 }
0x1a56   :  { %s1450_s12 = spop %1449  ;;  %s1051_s13 = smul.f32 0.1, %s1448_s11 }
0x1a57   :  { %s1065_s14 = smul.f32 0.1, %s1450_s12 }
0x1a58   :  { %v1066_v50 = vstv %s1051_s13 }
0x1a59   :  { %v1067_v17 = vstv %s1065_s14  ;;  %s1069_s17 = sadd.f32 %s1065_s14, %s1051_s13 }
0x1a5a   :  { %v1068_v53 = vsel %vm2033_vm9, %v1066_v50, %v1067_v17 }
0x1a5b   :  { %s1070_s0 = sadd.f32 %s1069_s17, %s780_s20  ;;  %v1353_v54 = vrot.slane %v1068_v53, 7 }
0x1a5d   :  { %v1358_v59 = vsel %vm545_vm12, %v779_v58, %v1353_v54 }
0x1a66   :  { %v1324_v33 = vpop.xlane.xlu1 %1323 }
0x1a67   :  { %v1325_v34 = vrot.slane %v1324_v33, 4 }
0x1a68   :  { %v1338_v47 = vpop.xlane.xlu2 %1337 }
0x1a69   :  { %v1326_v12 = vadd.f32 %v1325_v34, %v1324_v33  ;;  %v1339_v35 = vrot.slane %v1338_v47, 4 }
0x1a6b   :  { %v1327_v36 = vrot.slane %v1326_v12, 2  ;;  %v1340_v7 = vadd.f32 %v1339_v35, %v1338_v47 }
0x1a6d   :  { %v1328_v19 = vadd.f32 %v1327_v36, %v1326_v12  ;;  %v1341_v39 = vrot.slane %v1340_v7, 2 }
0x1a6f   :  { %v1342_v40 = vadd.f32 %v1341_v39, %v1340_v7  ;;  %v1329_v11 = vrot.slane %v1328_v19, 1 }
0x1a71   :  { %v1330_v41 = vadd.f32 %v1329_v11, %v1328_v19  ;;  %v1343_v42 = vrot.slane %v1342_v40, 1 }
0x1a73   :  { %1451 = vpush %v1330_v41  ;;  %v1344_v48 = vadd.f32 %v1343_v42, %v1342_v40 }
0x1a75   :  { %1453 = vpush %v1344_v48 }
0x1aa4   :  { %s1452_s18 = spop %1451 }
0x1aa5   :  { %s1332_s19 = smul.f32 0.05, %s1452_s18 }
0x1aa6   :  { %s1454_s21 = spop %1453 }
0x1aa7   :  { %s1346_s22 = smul.f32 0.05, %s1454_s21  ;;  %v1347_v51 = vstv %s1332_s19 }
0x1aa9   :  { %v1348_v55 = vstv %s1346_s22  ;;  %s1350_s1 = sadd.f32 %s1346_s22, %s1332_s19 }
0x1aaa   :  { %v1349_v52 = vsel %vm2034_vm8, %v1347_v51, %v1348_v55 }
0x1aab   :  { %s1351_s25 = sadd.f32 %s1350_s1, %s1070_s0  ;;  %v1356_v28 = vrot.slane %v1349_v52, 6 }
0x1aad   :  { %v1359_v26 = vsel %vm378_vm15, %v1358_v59, %v1356_v28  ;;  %s1362_s29 = smul.f32 0.33333334, %s1351_s25 }
0x1aae   :  { %1361 = vst.msk [vmem:[%s2020_s2] sm:$0x7] %vm1360_vm14, %v1359_v26 }
0x1aaf   :  { %v1363_v61 = vstv %s1362_s29 }
0x1ab0   :  { %1365 = vst.msk [vmem:[#allocation5] sm:$0x1] %vm1364_vm5, %v1363_v61 }
0x1ab1   :  { %1378 = dma.vmem_to_hbm [thread:$0]  %s1374_s24, 16, %s1376_s28, [#allocation4]  }
0x1ab2   :  { %1607 = dma.done.wait [#allocation4], 16  }
0x1ab3   :  { %1608 = vsyncadd [#allocation4], 4294967280 }
0x1ab4   :  { %1385 = vsyncpa [#allocation3], 1 }
0x1ab5   :  { %1386 = vsyncpa [#allocation4], 1 }

</bundles_post_ra>
